<compile_context>
chip_gen: v7x
topology: tpu7x:2x2x1
jax: 0.10.0
libtpu: 0.0.40
codegen_flags: <defaults>
</compile_context>

<pallas_src>
import functools

import jax
import jax.numpy as jnp
from jax.experimental import pallas as pl
from jax.experimental.pallas import tpu as pltpu


def _round_up(x, m):
    return (x + m - 1) // m * m


# --------------------------------------------------------------------------------------
# Pass 1: conv (in-kernel 3x3 taps) + bias, plus per-tile BatchNorm partial sums.
# --------------------------------------------------------------------------------------
def _conv_bias_stats_kernel(x_ref, w_ref, b_ref, y_ref, sum_ref, ssq_ref,
                            *, th, wo, cin, ksize):
    # x_ref:   (1, Hp, Wp, Cin)  full spatially padded image of batch element n
    #                            (same block index for every row-tile -> DMA'd once per n)
    # w_ref:   (ksize*ksize, Cin, Cp)  per-tap weight matrices, Cout zero-padded to Cp
    # b_ref:   (1, Cp)
    # y_ref:   (th*wo, Cp)  conv+bias rows for this (n, row-tile)  -- lane-dense
    # sum_ref/ssq_ref: (1, 1, Cp)  per-tile partial sums for the BN batch statistics
    hb = pl.program_id(1)
    row0 = pl.multiple_of(hb * th, th)          # first padded-input row of this tile
    cp = y_ref.shape[-1]

    acc = jnp.zeros((th * wo, cp), jnp.float32)
    for i in range(ksize):                      # unrolled taps: 9 skinny MXU matmuls
        for j in range(ksize):
            xs = x_ref[0, pl.ds(row0 + i, th), j:j + wo, :]      # (th, wo, cin)
            xs = xs.reshape(th * wo, cin)                        # fold rows onto sublanes
            acc = acc + jnp.dot(xs, w_ref[i * ksize + j],
                                preferred_element_type=jnp.float32)

    y = acc + b_ref[...]
    y_ref[...] = y
    sum_ref[0] = jnp.sum(y, axis=0, keepdims=True)
    ssq_ref[0] = jnp.sum(y * y, axis=0, keepdims=True)


# --------------------------------------------------------------------------------------
# Pass 2: y * scale + shift (folded BatchNorm) followed by HardSwish.
# --------------------------------------------------------------------------------------
def _bn_hswish_kernel(y_ref, scale_ref, shift_ref, out_ref):
    y = y_ref[...]
    yb = y * scale_ref[...] + shift_ref[...]
    # HardSwish: x * relu6(x + 3) / 6
    out_ref[...] = (yb * jnp.clip(yb + 3.0, 0.0, 6.0) * (1.0 / 6.0)).astype(out_ref.dtype)


def _pick_row_tile(h_out, w_out, cp, bytes_budget=4 * 1024 * 1024):
    """Largest divisor `th` of h_out with th*w_out a multiple of 8 (sublane aligned),
    aiming for >=512 rows per tile (amortize per-step overhead) while keeping the f32
    y tile under `bytes_budget` so double-buffered in/out tiles fit v7x's 64 MiB VMEM."""
    best = 1
    for th in range(1, h_out + 1):
        if h_out % th:
            continue
        rows = th * w_out
        if rows % 8 != 0 or rows * cp * 4 > bytes_budget:
            continue
        best = th
        if rows >= 512:
            break
    return best


@functools.partial(jax.jit, static_argnames=("ksize", "stride", "padding"))
def conv_block_forward(x, weight, bias, gamma, beta, *, ksize=3, stride=1, padding=1):
    """ConvBlock forward. x: (N, Cin, H, W) NCHW; weight: (Cout, Cin, Kh, Kw). Returns NCHW."""
    if stride != 1:
        # TODO(synk): stride > 1 (strided tap slicing) -- the module default stride=1 is
        # what ConvBlock uses here; only that path is implemented.
        raise NotImplementedError("Pallas ConvBlock kernel supports stride=1 only.")

    N, Cin, H, W = x.shape
    Cout = weight.shape[0]
    H_out = H + 2 * padding - ksize + 1
    W_out = W + 2 * padding - ksize + 1
    M = N * H_out * W_out
    Cp = _round_up(Cout, 128)                     # lane-dense channel axis

    # NCHW -> NHWC once; spatial zero-pad for the conv halo.  No im2col materialized:
    # the taps are read from the VMEM-resident tile inside the kernel.
    # (On v6e/v7x this input could be cast to bf16 to halve bandwidth; kept f32 here to
    #  match the f32 reference tolerance.)
    x_nhwc = jnp.transpose(x, (0, 2, 3, 1)).astype(jnp.float32)
    x_pad = jnp.pad(x_nhwc, ((0, 0), (padding, padding), (padding, padding), (0, 0)))
    Hp, Wp = H + 2 * padding, W + 2 * padding

    # Per-tap weight matrices (ksize*ksize, Cin, Cp); Cout zero-padded to Cp.
    w_taps = jnp.transpose(weight.astype(jnp.float32), (2, 3, 1, 0))
    w_taps = w_taps.reshape(ksize * ksize, Cin, Cout)
    w_taps = jnp.pad(w_taps, ((0, 0), (0, 0), (0, Cp - Cout)))
    b_row = jnp.pad(bias.astype(jnp.float32), (0, Cp - Cout)).reshape(1, Cp)

    th = _pick_row_tile(H_out, W_out, Cp)
    nHB = H_out // th
    tile_rows = th * W_out

    kern1 = functools.partial(_conv_bias_stats_kernel,
                              th=th, wo=W_out, cin=Cin, ksize=ksize)
    y_flat, psum, pssq = pl.pallas_call(
        kern1,
        out_shape=(
            jax.ShapeDtypeStruct((M, Cp), jnp.float32),            # conv + bias (lane-dense)
            jax.ShapeDtypeStruct((N * nHB, 1, Cp), jnp.float32),   # per-tile sum
            jax.ShapeDtypeStruct((N * nHB, 1, Cp), jnp.float32),   # per-tile sum of squares
        ),
        grid=(N, nHB),
        in_specs=[
            pl.BlockSpec((1, Hp, Wp, Cin), lambda n, hb: (n, 0, 0, 0)),
            pl.BlockSpec((ksize * ksize, Cin, Cp), lambda n, hb: (0, 0, 0)),
            pl.BlockSpec((1, Cp), lambda n, hb: (0, 0)),
        ],
        out_specs=(
            pl.BlockSpec((tile_rows, Cp), lambda n, hb: (n * nHB + hb, 0)),
            pl.BlockSpec((1, 1, Cp), lambda n, hb: (n * nHB + hb, 0, 0)),
            pl.BlockSpec((1, 1, Cp), lambda n, hb: (n * nHB + hb, 0, 0)),
        ),
        compiler_params=pltpu.CompilerParams(
            dimension_semantics=("parallel", "parallel")),
    )(x_pad, w_taps, b_row)

    # Fold global (biased, training-mode) BatchNorm stats into per-channel scale/shift.
    cnt = jnp.float32(M)
    s = jnp.sum(psum[:, 0, :], axis=0)
    ss = jnp.sum(pssq[:, 0, :], axis=0)
    mean = s / cnt
    var = jnp.maximum(ss / cnt - mean * mean, 0.0)
    inv = jax.lax.rsqrt(var + 1e-5)
    g_pad = jnp.pad(gamma.astype(jnp.float32), (0, Cp - Cout))
    b_pad = jnp.pad(beta.astype(jnp.float32), (0, Cp - Cout))
    scale = (g_pad * inv).reshape(1, Cp)
    shift = (b_pad - mean * g_pad * inv).reshape(1, Cp)

    # Pass 2: stream y once, normalize + HardSwish.  Reuses the pass-1 row tile
    # (divides M, sublane aligned); fully parallel grid.
    tm = tile_rows
    out_flat = pl.pallas_call(
        _bn_hswish_kernel,
        out_shape=jax.ShapeDtypeStruct((M, Cp), jnp.float32),
        grid=(M // tm,),
        in_specs=[
            pl.BlockSpec((tm, Cp), lambda i: (i, 0)),
            pl.BlockSpec((1, Cp), lambda i: (0, 0)),
            pl.BlockSpec((1, Cp), lambda i: (0, 0)),
        ],
        out_specs=pl.BlockSpec((tm, Cp), lambda i: (i, 0)),
        compiler_params=pltpu.CompilerParams(dimension_semantics=("parallel",)),
    )(y_flat, scale, shift)

    # Lane-dense slab -> logical channels; single transpose back to the module's NCHW.
    out = out_flat[:, :Cout].reshape(N, H_out, W_out, Cout)
    return jnp.transpose(out, (0, 3, 1, 2))


def _reference(x, weight, bias, gamma, beta, ksize=3, stride=1, padding=1):
    y = jax.lax.conv_general_dilated(
        x, weight, window_strides=(stride, stride),
        padding=[(padding, padding), (padding, padding)],
        dimension_numbers=("NCHW", "OIHW", "NCHW"),
        precision=jax.lax.Precision.HIGHEST,
    ) + bias.reshape(1, -1, 1, 1)
    mean = jnp.mean(y, axis=(0, 2, 3), keepdims=True)
    var = jnp.mean((y - mean) ** 2, axis=(0, 2, 3), keepdims=True)
    y_bn = (y - mean) * jax.lax.rsqrt(var + 1e-5) * gamma.reshape(1, -1, 1, 1) \
        + beta.reshape(1, -1, 1, 1)
    return y_bn * jnp.clip(y_bn + 3.0, 0.0, 6.0) / 6.0


if __name__ == "__main__":
    # Small shapes consistent with the module: N=2, Cin=4, H=W=16, Cout=8, k=3, s=1, p=1.
    N, Cin, H, W = 2, 4, 16, 16
    Cout, ksize, stride, padding = 8, 3, 1, 1

    key = jax.random.PRNGKey(0)
    kx, kw, kb, kg, kbe = jax.random.split(key, 5)
    x = jax.random.normal(kx, (N, Cin, H, W), dtype=jnp.float32)
    weight = jax.random.normal(kw, (Cout, Cin, ksize, ksize), dtype=jnp.float32) * 0.1
    bias = jax.random.normal(kb, (Cout,), dtype=jnp.float32) * 0.1
    gamma = 1.0 + 0.1 * jax.random.normal(kg, (Cout,), dtype=jnp.float32)
    beta = 0.1 * jax.random.normal(kbe, (Cout,), dtype=jnp.float32)

    out = conv_block_forward(x, weight, bias, gamma, beta,
                             ksize=ksize, stride=stride, padding=padding)
    out = jax.block_until_ready(out)

    ref = _reference(x, weight, bias, gamma, beta, ksize, stride, padding)
    assert out.shape == (N, Cout, H, W)
    err = float(jnp.max(jnp.abs(out - ref)))
    assert jnp.allclose(out, ref, rtol=2e-3, atol=2e-3), err

    print("KERNEL_OK")
</pallas_src>

<mosaic_0001>
module attributes {stable_mosaic.version = 11 : i64} {
  func.func @_bn_hswish_kernel(%arg0: i32, %arg1: memref<256x128xf32, #tpu.memory_space<vmem>>, %arg2: memref<1x128xf32, #tpu.memory_space<vmem>>, %arg3: memref<1x128xf32, #tpu.memory_space<vmem>>, %arg4: memref<256x128xf32, #tpu.memory_space<vmem>>) attributes {dimension_semantics = [#tpu.dimension_semantics<parallel>], iteration_bounds = array<i64: 2>, scalar_prefetch = 0 : i64, scratch_operands = 0 : i64, tpu.core_type = #tpu.core_type<tc>, window_params = [{transform_indices = @transform_0, window_bounds = array<i64: 256, 128>}, {pipeline_mode = #tpu.pipeline_mode<synchronous>, transform_indices = @transform_1, window_bounds = array<i64: 1, 128>}, {pipeline_mode = #tpu.pipeline_mode<synchronous>, transform_indices = @transform_2, window_bounds = array<i64: 1, 128>}, {transform_indices = @transform_3, window_bounds = array<i64: 256, 128>}]} {
    %c0 = arith.constant 0 : index
    %c0_0 = arith.constant 0 : index
    %0 = vector.load %arg1[%c0, %c0_0] : memref<256x128xf32, #tpu.memory_space<vmem>>, vector<256x128xf32>
    %c0_1 = arith.constant 0 : index
    %c0_2 = arith.constant 0 : index
    %1 = vector.load %arg2[%c0_1, %c0_2] : memref<1x128xf32, #tpu.memory_space<vmem>>, vector<1x128xf32>
    %2 = vector.broadcast %1 : vector<1x128xf32> to vector<256x128xf32>
    %3 = arith.mulf %0, %2 : vector<256x128xf32>
    %c0_3 = arith.constant 0 : index
    %c0_4 = arith.constant 0 : index
    %4 = vector.load %arg3[%c0_3, %c0_4] : memref<1x128xf32, #tpu.memory_space<vmem>>, vector<1x128xf32>
    %5 = vector.broadcast %4 : vector<1x128xf32> to vector<256x128xf32>
    %6 = arith.addf %3, %5 : vector<256x128xf32>
    %cst = arith.constant 3.000000e+00 : f32
    %7 = vector.broadcast %cst : f32 to vector<256x128xf32>
    %8 = arith.addf %6, %7 : vector<256x128xf32>
    %cst_5 = arith.constant 0.000000e+00 : f32
    %cst_6 = arith.constant 6.000000e+00 : f32
    %9 = vector.broadcast %cst_5 : f32 to vector<256x128xf32>
    %10 = arith.maximumf %9, %8 : vector<256x128xf32>
    %11 = vector.broadcast %cst_6 : f32 to vector<256x128xf32>
    %12 = arith.minimumf %11, %10 : vector<256x128xf32>
    %13 = arith.mulf %6, %12 : vector<256x128xf32>
    %cst_7 = arith.constant 0.166666672 : f32
    %14 = vector.broadcast %cst_7 : f32 to vector<256x128xf32>
    %15 = arith.mulf %13, %14 : vector<256x128xf32>
    %c0_8 = arith.constant 0 : index
    %c0_9 = arith.constant 0 : index
    %16 = vector.load %arg4[%c0_8, %c0_9] : memref<256x128xf32, #tpu.memory_space<vmem>>, vector<256x128xf32>
    tpu.vector_store %arg4[%c0_8, %c0_9], %15 {strides = array<i32>} : memref<256x128xf32, #tpu.memory_space<vmem>>, vector<256x128xf32>,
    return
  }
  func.func @transform_0(%arg0: i32) -> (i32, i32) {
    %c0_i32 = arith.constant 0 : i32
    %c0_i32_0 = arith.constant 0 : i32
    return %arg0, %c0_i32 : i32, i32
  }
  func.func @transform_1(%arg0: i32) -> (i32, i32) {
    %c0_i32 = arith.constant 0 : i32
    %c0_i32_0 = arith.constant 0 : i32
    %c0_i32_1 = arith.constant 0 : i32
    return %c0_i32, %c0_i32_0 : i32, i32
  }
  func.func @transform_2(%arg0: i32) -> (i32, i32) {
    %c0_i32 = arith.constant 0 : i32
    %c0_i32_0 = arith.constant 0 : i32
    %c0_i32_1 = arith.constant 0 : i32
    return %c0_i32, %c0_i32_0 : i32, i32
  }
  func.func @transform_3(%arg0: i32) -> (i32, i32) {
    %c0_i32 = arith.constant 0 : i32
    %c0_i32_0 = arith.constant 0 : i32
    return %arg0, %c0_i32 : i32, i32
  }
}

module attributes {stable_mosaic.version = 11 : i64} {
  func.func @_conv_bias_stats_kernel(%arg0: i32, %arg1: i32, %arg2: memref<1x18x18x4xf32, #tpu.memory_space<vmem>>, %arg3: memref<9x4x128xf32, #tpu.memory_space<vmem>>, %arg4: memref<1x128xf32, #tpu.memory_space<vmem>>, %arg5: memref<256x128xf32, #tpu.memory_space<vmem>>, %arg6: memref<1x1x128xf32, #tpu.memory_space<vmem>>, %arg7: memref<1x1x128xf32, #tpu.memory_space<vmem>>) attributes {dimension_semantics = [#tpu.dimension_semantics<parallel>, #tpu.dimension_semantics<parallel>], iteration_bounds = array<i64: 2, 1>, scalar_prefetch = 0 : i64, scratch_operands = 0 : i64, tpu.core_type = #tpu.core_type<tc>, window_params = [{transform_indices = @transform_0, window_bounds = array<i64: 1, 18, 18, 4>}, {pipeline_mode = #tpu.pipeline_mode<synchronous>, transform_indices = @transform_1, window_bounds = array<i64: 9, 4, 128>}, {pipeline_mode = #tpu.pipeline_mode<synchronous>, transform_indices = @transform_2, window_bounds = array<i64: 1, 128>}, {transform_indices = @transform_3, window_bounds = array<i64: 256, 128>}, {transform_indices = @transform_4, window_bounds = array<i64: 1, 1, 128>}, {transform_indices = @transform_5, window_bounds = array<i64: 1, 1, 128>}]} {
    %c16_i32 = arith.constant 16 : i32
    %0 = arith.muli %arg1, %c16_i32 : i32
    %1 = tpu.assume_multiple %0, 16 : i32
    %cst = arith.constant 0.000000e+00 : f32
    %2 = vector.broadcast %cst : f32 to vector<256x128xf32>
    %c0_i32 = arith.constant 0 : i32
    %3 = arith.addi %1, %c0_i32 : i32
    %c0 = arith.constant 0 : index
    %4 = arith.index_cast %3 : i32 to index
    %c0_0 = arith.constant 0 : index
    %c0_1 = arith.constant 0 : index
    %5 = vector.load %arg2[%c0, %4, %c0_0, %c0_1] : memref<1x18x18x4xf32, #tpu.memory_space<vmem>>, vector<1x16x16x4xf32>
    %6 = vector.shape_cast %5 : vector<1x16x16x4xf32> to vector<16x16x4xf32>
    %7 = vector.shape_cast %6 : vector<16x16x4xf32> to vector<256x4xf32>
    %c0_2 = arith.constant 0 : index
    %c0_3 = arith.constant 0 : index
    %c0_4 = arith.constant 0 : index
    %8 = vector.load %arg3[%c0_2, %c0_3, %c0_4] : memref<9x4x128xf32, #tpu.memory_space<vmem>>, vector<1x4x128xf32>
    %9 = vector.shape_cast %8 : vector<1x4x128xf32> to vector<4x128xf32>
    %cst_5 = arith.constant dense<0.000000e+00> : vector<256x128xf32>
    %10 = tpu.matmul %7, %9, %cst_5 {dimension_numbers = #tpu.dot_dimension_numbers<[1], [0], [0], [1], [0, 0, 1, 1], [], []>} : vector<256x4xf32>, vector<4x128xf32>, vector<256x128xf32> -> vector<256x128xf32>
    %11 = arith.addf %2, %10 : vector<256x128xf32>
    %c0_i32_6 = arith.constant 0 : i32
    %12 = arith.addi %1, %c0_i32_6 : i32
    %c0_7 = arith.constant 0 : index
    %13 = arith.index_cast %12 : i32 to index
    %c1 = arith.constant 1 : index
    %c0_8 = arith.constant 0 : index
    %14 = vector.load %arg2[%c0_7, %13, %c1, %c0_8] : memref<1x18x18x4xf32, #tpu.memory_space<vmem>>, vector<1x16x16x4xf32>
    %15 = vector.shape_cast %14 : vector<1x16x16x4xf32> to vector<16x16x4xf32>
    %16 = vector.shape_cast %15 : vector<16x16x4xf32> to vector<256x4xf32>
    %c1_9 = arith.constant 1 : index
    %c0_10 = arith.constant 0 : index
    %c0_11 = arith.constant 0 : index
    %17 = vector.load %arg3[%c1_9, %c0_10, %c0_11] : memref<9x4x128xf32, #tpu.memory_space<vmem>>, vector<1x4x128xf32>
    %18 = vector.shape_cast %17 : vector<1x4x128xf32> to vector<4x128xf32>
    %cst_12 = arith.constant dense<0.000000e+00> : vector<256x128xf32>
    %19 = tpu.matmul %16, %18, %cst_12 {dimension_numbers = #tpu.dot_dimension_numbers<[1], [0], [0], [1], [0, 0, 1, 1], [], []>} : vector<256x4xf32>, vector<4x128xf32>, vector<256x128xf32> -> vector<256x128xf32>
    %20 = arith.addf %11, %19 : vector<256x128xf32>
    %c0_i32_13 = arith.constant 0 : i32
    %21 = arith.addi %1, %c0_i32_13 : i32
    %c0_14 = arith.constant 0 : index
    %22 = arith.index_cast %21 : i32 to index
    %c2 = arith.constant 2 : index
    %c0_15 = arith.constant 0 : index
    %23 = vector.load %arg2[%c0_14, %22, %c2, %c0_15] : memref<1x18x18x4xf32, #tpu.memory_space<vmem>>, vector<1x16x16x4xf32>
    %24 = vector.shape_cast %23 : vector<1x16x16x4xf32> to vector<16x16x4xf32>
    %25 = vector.shape_cast %24 : vector<16x16x4xf32> to vector<256x4xf32>
    %c2_16 = arith.constant 2 : index
    %c0_17 = arith.constant 0 : index
    %c0_18 = arith.constant 0 : index
    %26 = vector.load %arg3[%c2_16, %c0_17, %c0_18] : memref<9x4x128xf32, #tpu.memory_space<vmem>>, vector<1x4x128xf32>
    %27 = vector.shape_cast %26 : vector<1x4x128xf32> to vector<4x128xf32>
    %cst_19 = arith.constant dense<0.000000e+00> : vector<256x128xf32>
    %28 = tpu.matmul %25, %27, %cst_19 {dimension_numbers = #tpu.dot_dimension_numbers<[1], [0], [0], [1], [0, 0, 1, 1], [], []>} : vector<256x4xf32>, vector<4x128xf32>, vector<256x128xf32> -> vector<256x128xf32>
    %29 = arith.addf %20, %28 : vector<256x128xf32>
    %c1_i32 = arith.constant 1 : i32
    %30 = arith.addi %1, %c1_i32 : i32
    %c0_20 = arith.constant 0 : index
    %31 = arith.index_cast %30 : i32 to index
    %c0_21 = arith.constant 0 : index
    %c0_22 = arith.constant 0 : index
    %32 = vector.load %arg2[%c0_20, %31, %c0_21, %c0_22] : memref<1x18x18x4xf32, #tpu.memory_space<vmem>>, vector<1x16x16x4xf32>
    %33 = vector.shape_cast %32 : vector<1x16x16x4xf32> to vector<16x16x4xf32>
    %34 = vector.shape_cast %33 : vector<16x16x4xf32> to vector<256x4xf32>
    %c3 = arith.constant 3 : index
    %c0_23 = arith.constant 0 : index
    %c0_24 = arith.constant 0 : index
    %35 = vector.load %arg3[%c3, %c0_23, %c0_24] : memref<9x4x128xf32, #tpu.memory_space<vmem>>, vector<1x4x128xf32>
    %36 = vector.shape_cast %35 : vector<1x4x128xf32> to vector<4x128xf32>
    %cst_25 = arith.constant dense<0.000000e+00> : vector<256x128xf32>
    %37 = tpu.matmul %34, %36, %cst_25 {dimension_numbers = #tpu.dot_dimension_numbers<[1], [0], [0], [1], [0, 0, 1, 1], [], []>} : vector<256x4xf32>, vector<4x128xf32>, vector<256x128xf32> -> vector<256x128xf32>
    %38 = arith.addf %29, %37 : vector<256x128xf32>
    %c1_i32_26 = arith.constant 1 : i32
    %39 = arith.addi %1, %c1_i32_26 : i32
    %c0_27 = arith.constant 0 : index
    %40 = arith.index_cast %39 : i32 to index
    %c1_28 = arith.constant 1 : index
    %c0_29 = arith.constant 0 : index
    %41 = vector.load %arg2[%c0_27, %40, %c1_28, %c0_29] : memref<1x18x18x4xf32, #tpu.memory_space<vmem>>, vector<1x16x16x4xf32>
    %42 = vector.shape_cast %41 : vector<1x16x16x4xf32> to vector<16x16x4xf32>
    %43 = vector.shape_cast %42 : vector<16x16x4xf32> to vector<256x4xf32>
    %c4 = arith.constant 4 : index
    %c0_30 = arith.constant 0 : index
    %c0_31 = arith.constant 0 : index
    %44 = vector.load %arg3[%c4, %c0_30, %c0_31] : memref<9x4x128xf32, #tpu.memory_space<vmem>>, vector<1x4x128xf32>
    %45 = vector.shape_cast %44 : vector<1x4x128xf32> to vector<4x128xf32>
    %cst_32 = arith.constant dense<0.000000e+00> : vector<256x128xf32>
    %46 = tpu.matmul %43, %45, %cst_32 {dimension_numbers = #tpu.dot_dimension_numbers<[1], [0], [0], [1], [0, 0, 1, 1], [], []>} : vector<256x4xf32>, vector<4x128xf32>, vector<256x128xf32> -> vector<256x128xf32>
    %47 = arith.addf %38, %46 : vector<256x128xf32>
    %c1_i32_33 = arith.constant 1 : i32
    %48 = arith.addi %1, %c1_i32_33 : i32
    %c0_34 = arith.constant 0 : index
    %49 = arith.index_cast %48 : i32 to index
    %c2_35 = arith.constant 2 : index
    %c0_36 = arith.constant 0 : index
    %50 = vector.load %arg2[%c0_34, %49, %c2_35, %c0_36] : memref<1x18x18x4xf32, #tpu.memory_space<vmem>>, vector<1x16x16x4xf32>
    %51 = vector.shape_cast %50 : vector<1x16x16x4xf32> to vector<16x16x4xf32>
    %52 = vector.shape_cast %51 : vector<16x16x4xf32> to vector<256x4xf32>
    %c5 = arith.constant 5 : index
    %c0_37 = arith.constant 0 : index
    %c0_38 = arith.constant 0 : index
    %53 = vector.load %arg3[%c5, %c0_37, %c0_38] : memref<9x4x128xf32, #tpu.memory_space<vmem>>, vector<1x4x128xf32>
    %54 = vector.shape_cast %53 : vector<1x4x128xf32> to vector<4x128xf32>
    %cst_39 = arith.constant dense<0.000000e+00> : vector<256x128xf32>
    %55 = tpu.matmul %52, %54, %cst_39 {dimension_numbers = #tpu.dot_dimension_numbers<[1], [0], [0], [1], [0, 0, 1, 1], [], []>} : vector<256x4xf32>, vector<4x128xf32>, vector<256x128xf32> -> vector<256x128xf32>
    %56 = arith.addf %47, %55 : vector<256x128xf32>
    %c2_i32 = arith.constant 2 : i32
    %57 = arith.addi %1, %c2_i32 : i32
    %c0_40 = arith.constant 0 : index
    %58 = arith.index_cast %57 : i32 to index
    %c0_41 = arith.constant 0 : index
    %c0_42 = arith.constant 0 : index
    %59 = vector.load %arg2[%c0_40, %58, %c0_41, %c0_42] : memref<1x18x18x4xf32, #tpu.memory_space<vmem>>, vector<1x16x16x4xf32>
    %60 = vector.shape_cast %59 : vector<1x16x16x4xf32> to vector<16x16x4xf32>
    %61 = vector.shape_cast %60 : vector<16x16x4xf32> to vector<256x4xf32>
    %c6 = arith.constant 6 : index
    %c0_43 = arith.constant 0 : index
    %c0_44 = arith.constant 0 : index
    %62 = vector.load %arg3[%c6, %c0_43, %c0_44] : memref<9x4x128xf32, #tpu.memory_space<vmem>>, vector<1x4x128xf32>
    %63 = vector.shape_cast %62 : vector<1x4x128xf32> to vector<4x128xf32>
    %cst_45 = arith.constant dense<0.000000e+00> : vector<256x128xf32>
    %64 = tpu.matmul %61, %63, %cst_45 {dimension_numbers = #tpu.dot_dimension_numbers<[1], [0], [0], [1], [0, 0, 1, 1], [], []>} : vector<256x4xf32>, vector<4x128xf32>, vector<256x128xf32> -> vector<256x128xf32>
    %65 = arith.addf %56, %64 : vector<256x128xf32>
    %c2_i32_46 = arith.constant 2 : i32
    %66 = arith.addi %1, %c2_i32_46 : i32
    %c0_47 = arith.constant 0 : index
    %67 = arith.index_cast %66 : i32 to index
    %c1_48 = arith.constant 1 : index
    %c0_49 = arith.constant 0 : index
    %68 = vector.load %arg2[%c0_47, %67, %c1_48, %c0_49] : memref<1x18x18x4xf32, #tpu.memory_space<vmem>>, vector<1x16x16x4xf32>
    %69 = vector.shape_cast %68 : vector<1x16x16x4xf32> to vector<16x16x4xf32>
    %70 = vector.shape_cast %69 : vector<16x16x4xf32> to vector<256x4xf32>
    %c7 = arith.constant 7 : index
    %c0_50 = arith.constant 0 : index
    %c0_51 = arith.constant 0 : index
    %71 = vector.load %arg3[%c7, %c0_50, %c0_51] : memref<9x4x128xf32, #tpu.memory_space<vmem>>, vector<1x4x128xf32>
    %72 = vector.shape_cast %71 : vector<1x4x128xf32> to vector<4x128xf32>
    %cst_52 = arith.constant dense<0.000000e+00> : vector<256x128xf32>
    %73 = tpu.matmul %70, %72, %cst_52 {dimension_numbers = #tpu.dot_dimension_numbers<[1], [0], [0], [1], [0, 0, 1, 1], [], []>} : vector<256x4xf32>, vector<4x128xf32>, vector<256x128xf32> -> vector<256x128xf32>
    %74 = arith.addf %65, %73 : vector<256x128xf32>
    %c2_i32_53 = arith.constant 2 : i32
    %75 = arith.addi %1, %c2_i32_53 : i32
    %c0_54 = arith.constant 0 : index
    %76 = arith.index_cast %75 : i32 to index
    %c2_55 = arith.constant 2 : index
    %c0_56 = arith.constant 0 : index
    %77 = vector.load %arg2[%c0_54, %76, %c2_55, %c0_56] : memref<1x18x18x4xf32, #tpu.memory_space<vmem>>, vector<1x16x16x4xf32>
    %78 = vector.shape_cast %77 : vector<1x16x16x4xf32> to vector<16x16x4xf32>
    %79 = vector.shape_cast %78 : vector<16x16x4xf32> to vector<256x4xf32>
    %c8 = arith.constant 8 : index
    %c0_57 = arith.constant 0 : index
    %c0_58 = arith.constant 0 : index
    %80 = vector.load %arg3[%c8, %c0_57, %c0_58] : memref<9x4x128xf32, #tpu.memory_space<vmem>>, vector<1x4x128xf32>
    %81 = vector.shape_cast %80 : vector<1x4x128xf32> to vector<4x128xf32>
    %cst_59 = arith.constant dense<0.000000e+00> : vector<256x128xf32>
    %82 = tpu.matmul %79, %81, %cst_59 {dimension_numbers = #tpu.dot_dimension_numbers<[1], [0], [0], [1], [0, 0, 1, 1], [], []>} : vector<256x4xf32>, vector<4x128xf32>, vector<256x128xf32> -> vector<256x128xf32>
    %83 = arith.addf %74, %82 : vector<256x128xf32>
    %c0_60 = arith.constant 0 : index
    %c0_61 = arith.constant 0 : index
    %84 = vector.load %arg4[%c0_60, %c0_61] : memref<1x128xf32, #tpu.memory_space<vmem>>, vector<1x128xf32>
    %85 = vector.broadcast %84 : vector<1x128xf32> to vector<256x128xf32>
    %86 = arith.addf %83, %85 : vector<256x128xf32>
    %c0_62 = arith.constant 0 : index
    %c0_63 = arith.constant 0 : index
    %87 = vector.load %arg5[%c0_62, %c0_63] : memref<256x128xf32, #tpu.memory_space<vmem>>, vector<256x128xf32>
    tpu.vector_store %arg5[%c0_62, %c0_63], %86 {strides = array<i32>} : memref<256x128xf32, #tpu.memory_space<vmem>>, vector<256x128xf32>,
    %cst_64 = arith.constant dense<0.000000e+00> : vector<128xf32>
    %88 = vector.multi_reduction <add>, %86, %cst_64 [0] : vector<256x128xf32> to vector<128xf32>
    %89 = vector.shape_cast %88 : vector<128xf32> to vector<1x128xf32>
    %c0_65 = arith.constant 0 : index
    %c0_66 = arith.constant 0 : index
    %c0_67 = arith.constant 0 : index
    %90 = vector.load %arg6[%c0_65, %c0_66, %c0_67] : memref<1x1x128xf32, #tpu.memory_space<vmem>>, vector<1x1x128xf32>
    %91 = vector.shape_cast %90 : vector<1x1x128xf32> to vector<1x128xf32>
    %92 = vector.shape_cast %89 : vector<1x128xf32> to vector<1x1x128xf32>
    tpu.vector_store %arg6[%c0_65, %c0_66, %c0_67], %92 {strides = array<i32>} : memref<1x1x128xf32, #tpu.memory_space<vmem>>, vector<1x1x128xf32>,
    %93 = arith.mulf %86, %86 : vector<256x128xf32>
    %cst_68 = arith.constant dense<0.000000e+00> : vector<128xf32>
    %94 = vector.multi_reduction <add>, %93, %cst_68 [0] : vector<256x128xf32> to vector<128xf32>
    %95 = vector.shape_cast %94 : vector<128xf32> to vector<1x128xf32>
    %c0_69 = arith.constant 0 : index
    %c0_70 = arith.constant 0 : index
    %c0_71 = arith.constant 0 : index
    %96 = vector.load %arg7[%c0_69, %c0_70, %c0_71] : memref<1x1x128xf32, #tpu.memory_space<vmem>>, vector<1x1x128xf32>
    %97 = vector.shape_cast %96 : vector<1x1x128xf32> to vector<1x128xf32>
    %98 = vector.shape_cast %95 : vector<1x128xf32> to vector<1x1x128xf32>
    tpu.vector_store %arg7[%c0_69, %c0_70, %c0_71], %98 {strides = array<i32>} : memref<1x1x128xf32, #tpu.memory_space<vmem>>, vector<1x1x128xf32>,
    return
  }
  func.func @transform_0(%arg0: i32, %arg1: i32) -> (i32, i32, i32, i32) {
    %c0_i32 = arith.constant 0 : i32
    %c0_i32_0 = arith.constant 0 : i32
    %c0_i32_1 = arith.constant 0 : i32
    %c0_i32_2 = arith.constant 0 : i32
    return %arg0, %c0_i32, %c0_i32_0, %c0_i32_1 : i32, i32, i32, i32
  }
  func.func @transform_1(%arg0: i32, %arg1: i32) -> (i32, i32, i32) {
    %c0_i32 = arith.constant 0 : i32
    %c0_i32_0 = arith.constant 0 : i32
    %c0_i32_1 = arith.constant 0 : i32
    %c0_i32_2 = arith.constant 0 : i32
    return %c0_i32, %c0_i32_0, %c0_i32_1 : i32, i32, i32
  }
  func.func @transform_2(%arg0: i32, %arg1: i32) -> (i32, i32) {
    %c0_i32 = arith.constant 0 : i32
    %c0_i32_0 = arith.constant 0 : i32
    %c0_i32_1 = arith.constant 0 : i32
    return %c0_i32, %c0_i32_0 : i32, i32
  }
  func.func @transform_3(%arg0: i32, %arg1: i32) -> (i32, i32) {
    %c1_i32 = arith.constant 1 : i32
    %0 = arith.muli %arg0, %c1_i32 : i32
    %1 = arith.addi %0, %arg1 : i32
    %c0_i32 = arith.constant 0 : i32
    %c0_i32_0 = arith.constant 0 : i32
    return %1, %c0_i32 : i32, i32
  }
  func.func @transform_4(%arg0: i32, %arg1: i32) -> (i32, i32, i32) {
    %c1_i32 = arith.constant 1 : i32
    %0 = arith.muli %arg0, %c1_i32 : i32
    %1 = arith.addi %0, %arg1 : i32
    %c0_i32 = arith.constant 0 : i32
    %c0_i32_0 = arith.constant 0 : i32
    %c0_i32_1 = arith.constant 0 : i32
    return %1, %c0_i32, %c0_i32_0 : i32, i32, i32
  }
  func.func @transform_5(%arg0: i32, %arg1: i32) -> (i32, i32, i32) {
    %c1_i32 = arith.constant 1 : i32
    %0 = arith.muli %arg0, %c1_i32 : i32
    %1 = arith.addi %0, %arg1 : i32
    %c0_i32 = arith.constant 0 : i32
    %c0_i32_0 = arith.constant 0 : i32
    %c0_i32_1 = arith.constant 0 : i32
    return %1, %c0_i32, %c0_i32_0 : i32, i32, i32
  }
}

</mosaic_0001>

<bundles_post_ra>
// kernel: conv_block_forward.3
= control target key start
LH: loop header
LB: loop body
LE: loop exit
PB: predicated region body
PF: predicated region fallthrough
CT: control target
= control target key end

     0   :  { %s581_s12 = smov 0   ;;  %s747_s0 = inlined_call_operand.vmem [shape: f32[512,128], index: 0, kind: input, shape index: {}]   ;;  %s748_s1 = inlined_call_operand.vmem [shape: f32[1,128], index: 1, kind: input, shape index: {}]   ;;  %s749_s2 = inlined_call_operand.vmem [shape: f32[1,128], index: 2, kind: input, shape index: {}]   ;;  %s750_s3 = inlined_call_operand.vmem [shape: f32[512,128], index: 3, kind: output, shape index: {}]  }
   0x1 LB: > { %s532_s13 = sadd.s32 4294967295, %s559_s12   ;;  %p536_p0 = scmp.ge.s32.totalorder %s559_s12, 1  ;;  %s559_s12 = sphi %s581_s12, %s13_s12  }
   0x2   : > { %p138_p1 = scmp.lt.s32.totalorder %s559_s12, 3 }
   0x4   : > { %p139_p2 = pnand %p536_p0, %p138_p1 }
   0x5   : > { %s537_s14 = sshll.u32 (!%p139_p2), %s532_s13, 5  ;;  %v595_v0 = vld [vmem:[%s748_s1] ss:$0 sm:$0xff] (!%p139_p2) }
   0x6   : > { %142 = sbr.rel (%p139_p2) target bundleno = 78 (0x4e), region = 32  ;;  %p163_p3 = scmp.lt.s32.totalorder (!%p139_p2), %s537_s14, 63  ;;  %v607_v1 = vld [vmem:[%s749_s2] ss:$0 sm:$0xff] (!%p139_p2) }
   0xd   : > { %s752_s14 = smov (!%p163_p3, %s537_s14), 63 }
   0xe   : > { %s538_s15 = sshll.u32 %s752_s14, 3 }
   0xf   : > { %s602_s20 = scalar_lea.vmem %s747_s0, %s538_s15  ;;  %s642_s25 = scalar_lea.vmem %s750_s3, %s538_s15 }
  0x10   : > { %v174_v2 = vld [vmem:[%s602_s20] sm:$0xff]  ;;  %v175_v3 = vld [vmem:[%s602_s20 + $0x8] sm:$0xff]  ;;  %v176_v4 = vld [vmem:[%s602_s20 + $0x10] sm:$0xff] }
  0x11   : > { %v213_v5 = vmul.f32 %v595_v0, %v174_v2  ;;  %v214_v6 = vmul.f32 %v595_v0, %v175_v3  ;;  %v215_v7 = vmul.f32 %v595_v0, %v176_v4  ;;  %v177_v8 = vld [vmem:[%s602_s20 + $0x18] sm:$0xff]  ;;  %v178_v9 = vld [vmem:[%s602_s20 + $0x20] sm:$0xff]  ;;  %v179_v10 = vld [vmem:[%s602_s20 + $0x28] sm:$0xff] }
  0x12   : > { %v216_v11 = vmul.f32 %v595_v0, %v177_v8  ;;  %v217_v12 = vmul.f32 %v595_v0, %v178_v9  ;;  %v218_v13 = vmul.f32 %v595_v0, %v179_v10  ;;  %v180_v14 = vld [vmem:[%s602_s20 + $0x30] sm:$0xff]  ;;  %v181_v15 = vld [vmem:[%s602_s20 + $0x38] sm:$0xff]  ;;  %v182_v48 = vld [vmem:[%s602_s20 + $0x40] sm:$0xff] }
  0x13   : > { %v252_v16 = vadd.f32 %v607_v1, %v213_v5  ;;  %v253_v17 = vadd.f32 %v607_v1, %v214_v6  ;;  %v254_v18 = vadd.f32 %v607_v1, %v215_v7  ;;  %v219_v19 = vmul.f32 %v595_v0, %v180_v14  ;;  %v183_v53 = vld [vmem:[%s602_s20 + $0x48] sm:$0xff]  ;;  %v184_v54 = vld [vmem:[%s602_s20 + $0x50] sm:$0xff]  ;;  %v185_v55 = vld [vmem:[%s602_s20 + $0x58] sm:$0xff] }
  0x14   : > { %v255_v20 = vadd.f32 %v607_v1, %v216_v11  ;;  %v256_v21 = vadd.f32 %v607_v1, %v217_v12  ;;  %v257_v22 = vadd.f32 %v607_v1, %v218_v13  ;;  %v220_v23 = vmul.f32 %v595_v0, %v181_v15  ;;  %v186_v60 = vld [vmem:[%s602_s20 + $0x60] sm:$0xff]  ;;  %v187_v61 = vld [vmem:[%s602_s20 + $0x68] sm:$0xff]  ;;  %v188_v62 = vld [vmem:[%s602_s20 + $0x70] sm:$0xff] }
  0x15   : > { %v284_v24 = vadd.f32 3.0, %v252_v16  ;;  %v285_v25 = vadd.f32 3.0, %v253_v17  ;;  %v286_v26 = vadd.f32 3.0, %v254_v18  ;;  %v258_v27 = vadd.f32 %v607_v1, %v219_v19  ;;  %v189_v13 = vld [vmem:[%s602_s20 + $0x78] sm:$0xff] }
  0x16   : > { %v287_v28 = vadd.f32 3.0, %v255_v20  ;;  %v288_v29 = vadd.f32 3.0, %v256_v21  ;;  %v289_v30 = vadd.f32 3.0, %v257_v22  ;;  %v259_v31 = vadd.f32 %v607_v1, %v220_v23 }
  0x17   : > { %v316_v32 = vmax.f32 %v284_v24, 0.0  ;;  %v317_v33 = vmax.f32 %v285_v25, 0.0  ;;  %v318_v34 = vmax.f32 %v286_v26, 0.0  ;;  %v290_v35 = vadd.f32 3.0, %v258_v27 }
  0x18   : > { %v319_v36 = vmax.f32 %v287_v28, 0.0  ;;  %v320_v37 = vmax.f32 %v288_v29, 0.0  ;;  %v321_v38 = vmax.f32 %v289_v30, 0.0  ;;  %v291_v39 = vadd.f32 3.0, %v259_v31 }
  0x19   : > { %v348_v40 = vmin.f32 %v316_v32, 6.0  ;;  %v349_v41 = vmin.f32 %v317_v33, 6.0  ;;  %v350_v42 = vmin.f32 %v318_v34, 6.0  ;;  %v322_v43 = vmax.f32 %v290_v35, 0.0 }
  0x1a   : > { %v351_v44 = vmin.f32 %v319_v36, 6.0  ;;  %v352_v45 = vmin.f32 %v320_v37, 6.0  ;;  %v353_v46 = vmin.f32 %v321_v38, 6.0  ;;  %v323_v47 = vmax.f32 %v291_v39, 0.0 }
  0x1b   : > { %v380_v49 = vmul.f32 %v348_v40, %v252_v16  ;;  %v381_v50 = vmul.f32 %v349_v41, %v253_v17  ;;  %v382_v51 = vmul.f32 %v350_v42, %v254_v18  ;;  %v354_v52 = vmin.f32 %v322_v43, 6.0 }
  0x1c   : > { %v383_v56 = vmul.f32 %v351_v44, %v255_v20  ;;  %v384_v57 = vmul.f32 %v352_v45, %v256_v21  ;;  %v385_v58 = vmul.f32 %v353_v46, %v257_v22  ;;  %v355_v59 = vmin.f32 %v323_v47, 6.0 }
  0x1d   : > { %v412_v63 = vmul.f32 0.16666667, %v380_v49  ;;  %v413_v2 = vmul.f32 0.16666667, %v381_v50  ;;  %v414_v3 = vmul.f32 0.16666667, %v382_v51  ;;  %v386_v4 = vmul.f32 %v354_v52, %v258_v27 }
  0x1e   : > { %v415_v5 = vmul.f32 0.16666667, %v383_v56  ;;  %v416_v6 = vmul.f32 0.16666667, %v384_v57  ;;  %v417_v7 = vmul.f32 0.16666667, %v385_v58  ;;  %v387_v8 = vmul.f32 %v355_v59, %v259_v31 }
  0x1f   : > { %444 = vst [vmem:[%s642_s25] sm:$0xff] %v412_v63  ;;  %445 = vst [vmem:[%s642_s25 + $0x8] sm:$0xff] %v413_v2  ;;  %v418_v9 = vmul.f32 0.16666667, %v386_v4  ;;  %v221_v10 = vmul.f32 %v595_v0, %v182_v48  ;;  %v222_v11 = vmul.f32 %v595_v0, %v183_v53  ;;  %v223_v12 = vmul.f32 %v595_v0, %v184_v54  ;;  %v190_v50 = vld [vmem:[%s602_s20 + $0x80] sm:$0xff]  ;;  %v192_v56 = vld [vmem:[%s602_s20 + $0x90] sm:$0xff] }
  0x20   : > { %446 = vst [vmem:[%s642_s25 + $0x10] sm:$0xff] %v414_v3  ;;  %447 = vst [vmem:[%s642_s25 + $0x18] sm:$0xff] %v415_v5  ;;  %v419_v14 = vmul.f32 0.16666667, %v387_v8  ;;  %v224_v15 = vmul.f32 %v595_v0, %v185_v55  ;;  %v225_v16 = vmul.f32 %v595_v0, %v186_v60  ;;  %v226_v17 = vmul.f32 %v595_v0, %v187_v61  ;;  %v191_v55 = vld [vmem:[%s602_s20 + $0x88] sm:$0xff]  ;;  %v193_v57 = vld [vmem:[%s602_s20 + $0x98] sm:$0xff] }
  0x21   : > { %448 = vst [vmem:[%s642_s25 + $0x20] sm:$0xff] %v416_v6  ;;  %449 = vst [vmem:[%s642_s25 + $0x28] sm:$0xff] %v417_v7  ;;  %v260_v18 = vadd.f32 %v607_v1, %v221_v10  ;;  %v261_v19 = vadd.f32 %v607_v1, %v222_v11  ;;  %v262_v20 = vadd.f32 %v607_v1, %v223_v12  ;;  %v195_v63 = vld [vmem:[%s602_s20 + $0xa8] sm:$0xff]  ;;  %v196_v2 = vld [vmem:[%s602_s20 + $0xb0] sm:$0xff] }
  0x22   : > { %450 = vst [vmem:[%s642_s25 + $0x30] sm:$0xff] %v418_v9  ;;  %v227_v21 = vmul.f32 %v595_v0, %v188_v62  ;;  %451 = vst [vmem:[%s642_s25 + $0x38] sm:$0xff] %v419_v14  ;;  %v263_v22 = vadd.f32 %v607_v1, %v224_v15  ;;  %v264_v23 = vadd.f32 %v607_v1, %v225_v16  ;;  %v194_v62 = vld [vmem:[%s602_s20 + $0xa0] sm:$0xff]  ;;  %v197_v15 = vld [vmem:[%s602_s20 + $0xb8] sm:$0xff] }
  0x23   : > { %v265_v24 = vadd.f32 %v607_v1, %v226_v17  ;;  %v228_v25 = vmul.f32 %v595_v0, %v189_v13  ;;  %v292_v26 = vadd.f32 3.0, %v260_v18  ;;  %v293_v27 = vadd.f32 3.0, %v261_v19 }
  0x24   : > { %v294_v28 = vadd.f32 3.0, %v262_v20  ;;  %v266_v29 = vadd.f32 %v607_v1, %v227_v21  ;;  %v295_v30 = vadd.f32 3.0, %v263_v22  ;;  %v296_v31 = vadd.f32 3.0, %v264_v23 }
  0x25   : > { %v297_v32 = vadd.f32 3.0, %v265_v24  ;;  %v267_v33 = vadd.f32 %v607_v1, %v228_v25  ;;  %v324_v34 = vmax.f32 %v292_v26, 0.0  ;;  %v325_v35 = vmax.f32 %v293_v27, 0.0 }
  0x26   : > { %v326_v36 = vmax.f32 %v294_v28, 0.0  ;;  %v298_v37 = vadd.f32 3.0, %v266_v29  ;;  %v327_v38 = vmax.f32 %v295_v30, 0.0  ;;  %v328_v39 = vmax.f32 %v296_v31, 0.0 }
  0x27   : > { %v329_v40 = vmax.f32 %v297_v32, 0.0  ;;  %v299_v41 = vadd.f32 3.0, %v267_v33  ;;  %v356_v42 = vmin.f32 %v324_v34, 6.0  ;;  %v357_v43 = vmin.f32 %v325_v35, 6.0 }
  0x28   : > { %v358_v44 = vmin.f32 %v326_v36, 6.0  ;;  %v330_v45 = vmax.f32 %v298_v37, 0.0  ;;  %v359_v46 = vmin.f32 %v327_v38, 6.0  ;;  %v360_v47 = vmin.f32 %v328_v39, 6.0 }
  0x29   : > { %v361_v48 = vmin.f32 %v329_v40, 6.0  ;;  %v331_v49 = vmax.f32 %v299_v41, 0.0  ;;  %v388_v51 = vmul.f32 %v356_v42, %v260_v18  ;;  %v389_v52 = vmul.f32 %v357_v43, %v261_v19 }
  0x2a   : > { %v390_v53 = vmul.f32 %v358_v44, %v262_v20  ;;  %v362_v54 = vmin.f32 %v330_v45, 6.0  ;;  %v391_v58 = vmul.f32 %v359_v46, %v263_v22  ;;  %v392_v59 = vmul.f32 %v360_v47, %v264_v23 }
  0x2b   : > { %v393_v60 = vmul.f32 %v361_v48, %v265_v24  ;;  %v363_v61 = vmin.f32 %v331_v49, 6.0  ;;  %v420_v3 = vmul.f32 0.16666667, %v388_v51  ;;  %v421_v4 = vmul.f32 0.16666667, %v389_v52  ;;  %v198_v52 = vld [vmem:[%s602_s20 + $0xc0] sm:$0xff] }
  0x2c   : > { %v422_v5 = vmul.f32 0.16666667, %v390_v53  ;;  %v394_v6 = vmul.f32 %v362_v54, %v266_v29  ;;  %v423_v7 = vmul.f32 0.16666667, %v391_v58  ;;  %v424_v8 = vmul.f32 0.16666667, %v392_v59 }
  0x2d   : > { %v425_v9 = vmul.f32 0.16666667, %v393_v60  ;;  %v395_v10 = vmul.f32 %v363_v61, %v267_v33  ;;  %452 = vst [vmem:[%s642_s25 + $0x40] sm:$0xff] %v420_v3  ;;  %453 = vst [vmem:[%s642_s25 + $0x48] sm:$0xff] %v421_v4  ;;  %v229_v12 = vmul.f32 %v595_v0, %v190_v50  ;;  %v230_v13 = vmul.f32 %v595_v0, %v191_v55  ;;  %v200_v58 = vld [vmem:[%s602_s20 + $0xd0] sm:$0xff]  ;;  %v201_v59 = vld [vmem:[%s602_s20 + $0xd8] sm:$0xff] }
  0x2e   : > { %454 = vst [vmem:[%s642_s25 + $0x50] sm:$0xff] %v422_v5  ;;  %v426_v11 = vmul.f32 0.16666667, %v394_v6  ;;  %v231_v14 = vmul.f32 %v595_v0, %v192_v56  ;;  %455 = vst [vmem:[%s642_s25 + $0x58] sm:$0xff] %v423_v7  ;;  %v232_v17 = vmul.f32 %v595_v0, %v193_v57  ;;  %v233_v18 = vmul.f32 %v595_v0, %v194_v62  ;;  %v199_v57 = vld [vmem:[%s602_s20 + $0xc8] sm:$0xff]  ;;  %v204_v4 = vld [vmem:[%s602_s20 + $0xf0] sm:$0xff] }
  0x2f   : > { %456 = vst [vmem:[%s642_s25 + $0x60] sm:$0xff] %v424_v8  ;;  %457 = vst [vmem:[%s642_s25 + $0x68] sm:$0xff] %v425_v9  ;;  %v427_v16 = vmul.f32 0.16666667, %v395_v10  ;;  %v234_v19 = vmul.f32 %v595_v0, %v195_v63  ;;  %v268_v20 = vadd.f32 %v607_v1, %v229_v12  ;;  %v269_v21 = vadd.f32 %v607_v1, %v230_v13  ;;  %v203_v3 = vld [vmem:[%s602_s20 + $0xe8] sm:$0xff] }
  0x30   : > { %458 = vst [vmem:[%s642_s25 + $0x70] sm:$0xff] %v426_v11  ;;  %v270_v22 = vadd.f32 %v607_v1, %v231_v14  ;;  %v235_v23 = vmul.f32 %v595_v0, %v196_v2  ;;  %v271_v24 = vadd.f32 %v607_v1, %v232_v17  ;;  %v272_v25 = vadd.f32 %v607_v1, %v233_v18  ;;  %v202_v2 = vld [vmem:[%s602_s20 + $0xe0] sm:$0xff]  ;;  %v205_v17 = vld [vmem:[%s602_s20 + $0xf8] sm:$0xff] }
  0x31   : > { %459 = vst [vmem:[%s642_s25 + $0x78] sm:$0xff] %v427_v16  ;;  %v273_v26 = vadd.f32 %v607_v1, %v234_v19  ;;  %v236_v27 = vmul.f32 %v595_v0, %v197_v15  ;;  %v300_v28 = vadd.f32 3.0, %v268_v20  ;;  %v301_v29 = vadd.f32 3.0, %v269_v21 }
  0x32   : > { %v302_v30 = vadd.f32 3.0, %v270_v22  ;;  %v274_v31 = vadd.f32 %v607_v1, %v235_v23  ;;  %v303_v32 = vadd.f32 3.0, %v271_v24  ;;  %v304_v33 = vadd.f32 3.0, %v272_v25 }
  0x33   : > { %v305_v34 = vadd.f32 3.0, %v273_v26  ;;  %v275_v35 = vadd.f32 %v607_v1, %v236_v27  ;;  %v332_v36 = vmax.f32 %v300_v28, 0.0  ;;  %v333_v37 = vmax.f32 %v301_v29, 0.0 }
  0x34   : > { %v334_v38 = vmax.f32 %v302_v30, 0.0  ;;  %v306_v39 = vadd.f32 3.0, %v274_v31  ;;  %v335_v40 = vmax.f32 %v303_v32, 0.0  ;;  %v336_v41 = vmax.f32 %v304_v33, 0.0 }
  0x35   : > { %v337_v42 = vmax.f32 %v305_v34, 0.0  ;;  %v307_v43 = vadd.f32 3.0, %v275_v35  ;;  %v364_v44 = vmin.f32 %v332_v36, 6.0  ;;  %v365_v45 = vmin.f32 %v333_v37, 6.0 }
  0x36   : > { %v366_v46 = vmin.f32 %v334_v38, 6.0  ;;  %v338_v47 = vmax.f32 %v306_v39, 0.0  ;;  %v367_v48 = vmin.f32 %v335_v40, 6.0  ;;  %v368_v49 = vmin.f32 %v336_v41, 6.0 }
  0x37   : > { %v369_v50 = vmin.f32 %v337_v42, 6.0  ;;  %v339_v51 = vmax.f32 %v307_v43, 0.0  ;;  %v396_v53 = vmul.f32 %v364_v44, %v268_v20  ;;  %v397_v54 = vmul.f32 %v365_v45, %v269_v21 }
  0x38   : > { %v398_v55 = vmul.f32 %v366_v46, %v270_v22  ;;  %v370_v56 = vmin.f32 %v338_v47, 6.0  ;;  %v399_v60 = vmul.f32 %v367_v48, %v271_v24  ;;  %v400_v61 = vmul.f32 %v368_v49, %v272_v25 }
  0x39   : > { %v401_v62 = vmul.f32 %v369_v50, %v273_v26  ;;  %v371_v63 = vmin.f32 %v339_v51, 6.0  ;;  %v428_v5 = vmul.f32 0.16666667, %v396_v53  ;;  %v429_v6 = vmul.f32 0.16666667, %v397_v54 }
  0x3a   : > { %v430_v7 = vmul.f32 0.16666667, %v398_v55  ;;  %v402_v8 = vmul.f32 %v370_v56, %v274_v31  ;;  %v431_v9 = vmul.f32 0.16666667, %v399_v60  ;;  %v432_v10 = vmul.f32 0.16666667, %v400_v61 }
  0x3b   : > { %v433_v11 = vmul.f32 0.16666667, %v401_v62  ;;  %v403_v12 = vmul.f32 %v371_v63, %v275_v35  ;;  %460 = vst [vmem:[%s642_s25 + $0x80] sm:$0xff] %v428_v5  ;;  %461 = vst [vmem:[%s642_s25 + $0x88] sm:$0xff] %v429_v6  ;;  %v237_v14 = vmul.f32 %v595_v0, %v198_v52  ;;  %v238_v15 = vmul.f32 %v595_v0, %v199_v57 }
  0x3c   : > { %462 = vst [vmem:[%s642_s25 + $0x90] sm:$0xff] %v430_v7  ;;  %v434_v13 = vmul.f32 0.16666667, %v402_v8  ;;  %v239_v16 = vmul.f32 %v595_v0, %v200_v58  ;;  %463 = vst [vmem:[%s642_s25 + $0x98] sm:$0xff] %v431_v9  ;;  %v240_v19 = vmul.f32 %v595_v0, %v201_v59  ;;  %v241_v20 = vmul.f32 %v595_v0, %v202_v2 }
  0x3d   : > { %464 = vst [vmem:[%s642_s25 + $0xa0] sm:$0xff] %v432_v10  ;;  %465 = vst [vmem:[%s642_s25 + $0xa8] sm:$0xff] %v433_v11  ;;  %v435_v18 = vmul.f32 0.16666667, %v403_v12  ;;  %v242_v21 = vmul.f32 %v595_v0, %v203_v3  ;;  %v276_v22 = vadd.f32 %v607_v1, %v237_v14  ;;  %v277_v23 = vadd.f32 %v607_v1, %v238_v15 }
  0x3e   : > { %466 = vst [vmem:[%s642_s25 + $0xb0] sm:$0xff] %v434_v13  ;;  %v278_v24 = vadd.f32 %v607_v1, %v239_v16  ;;  %v243_v25 = vmul.f32 %v595_v0, %v204_v4  ;;  %v279_v26 = vadd.f32 %v607_v1, %v240_v19  ;;  %v280_v27 = vadd.f32 %v607_v1, %v241_v20 }
  0x3f   : > { %467 = vst [vmem:[%s642_s25 + $0xb8] sm:$0xff] %v435_v18  ;;  %v281_v28 = vadd.f32 %v607_v1, %v242_v21  ;;  %v244_v29 = vmul.f32 %v595_v0, %v205_v17  ;;  %v308_v30 = vadd.f32 3.0, %v276_v22  ;;  %v309_v31 = vadd.f32 3.0, %v277_v23 }
  0x40   : > { %v310_v32 = vadd.f32 3.0, %v278_v24  ;;  %v282_v33 = vadd.f32 %v607_v1, %v243_v25  ;;  %v311_v34 = vadd.f32 3.0, %v279_v26  ;;  %v312_v35 = vadd.f32 3.0, %v280_v27 }
  0x41   : > { %v313_v36 = vadd.f32 3.0, %v281_v28  ;;  %v283_v37 = vadd.f32 %v607_v1, %v244_v29  ;;  %v340_v38 = vmax.f32 %v308_v30, 0.0  ;;  %v341_v39 = vmax.f32 %v309_v31, 0.0 }
  0x42   : > { %v342_v40 = vmax.f32 %v310_v32, 0.0  ;;  %v314_v41 = vadd.f32 3.0, %v282_v33  ;;  %v343_v42 = vmax.f32 %v311_v34, 0.0  ;;  %v344_v43 = vmax.f32 %v312_v35, 0.0 }
  0x43   : > { %v345_v44 = vmax.f32 %v313_v36, 0.0  ;;  %v315_v45 = vadd.f32 3.0, %v283_v37  ;;  %v372_v46 = vmin.f32 %v340_v38, 6.0  ;;  %v373_v0 = vmin.f32 %v341_v39, 6.0 }
  0x44   : > { %v374_v47 = vmin.f32 %v342_v40, 6.0  ;;  %v346_v48 = vmax.f32 %v314_v41, 0.0  ;;  %v375_v49 = vmin.f32 %v343_v42, 6.0  ;;  %v376_v50 = vmin.f32 %v344_v43, 6.0 }
  0x45   : > { %v377_v51 = vmin.f32 %v345_v44, 6.0  ;;  %v347_v52 = vmax.f32 %v315_v45, 0.0  ;;  %v404_v53 = vmul.f32 %v372_v46, %v276_v22  ;;  %v405_v54 = vmul.f32 %v373_v0, %v277_v23 }
  0x46   : > { %v406_v1 = vmul.f32 %v374_v47, %v278_v24  ;;  %v378_v55 = vmin.f32 %v346_v48, 6.0  ;;  %v407_v56 = vmul.f32 %v375_v49, %v279_v26  ;;  %v408_v57 = vmul.f32 %v376_v50, %v280_v27 }
  0x47   : > { %v409_v58 = vmul.f32 %v377_v51, %v281_v28  ;;  %v379_v59 = vmin.f32 %v347_v52, 6.0  ;;  %v436_v60 = vmul.f32 0.16666667, %v404_v53  ;;  %v437_v61 = vmul.f32 0.16666667, %v405_v54 }
  0x48   : > { %v438_v62 = vmul.f32 0.16666667, %v406_v1  ;;  %v410_v63 = vmul.f32 %v378_v55, %v282_v33  ;;  %v439_v2 = vmul.f32 0.16666667, %v407_v56  ;;  %v440_v3 = vmul.f32 0.16666667, %v408_v57 }
  0x49   : > { %v441_v4 = vmul.f32 0.16666667, %v409_v58  ;;  %v411_v5 = vmul.f32 %v379_v59, %v283_v37  ;;  %468 = vst [vmem:[%s642_s25 + $0xc0] sm:$0xff] %v436_v60  ;;  %469 = vst [vmem:[%s642_s25 + $0xc8] sm:$0xff] %v437_v61 }
  0x4a   : > { %470 = vst [vmem:[%s642_s25 + $0xd0] sm:$0xff] %v438_v62  ;;  %v442_v6 = vmul.f32 0.16666667, %v410_v63  ;;  %471 = vst [vmem:[%s642_s25 + $0xd8] sm:$0xff] %v439_v2 }
  0x4b   : > { %472 = vst [vmem:[%s642_s25 + $0xe0] sm:$0xff] %v440_v3  ;;  %473 = vst [vmem:[%s642_s25 + $0xe8] sm:$0xff] %v441_v4  ;;  %v443_v7 = vmul.f32 0.16666667, %v411_v5 }
  0x4c   : > { %474 = vst [vmem:[%s642_s25 + $0xf0] sm:$0xff] %v442_v6 }
  0x4d   : > { %475 = vst [vmem:[%s642_s25 + $0xf8] sm:$0xff] %v443_v7 }
  0x4e PF: > { %s13_s12 = sadd.s32 1, %s559_s12  }
  0x4f   : > { %p10_p4 = scmp.ge.s32.totalorder %s13_s12, 4  }
  0x51   :  { %12 = sbr.rel (!%p10_p4) target bundleno = 1 (0x1), region = 62 }

// kernel: conv_block_forward.2
= control target key start
LH: loop header
LB: loop body
LE: loop exit
PB: predicated region body
PF: predicated region fallthrough
CT: control target
= control target key end

     0   :  { %s5631_s18 = smov 0   ;;  %s5633_s19 = smov 0   ;;  %s6699_s0 = inlined_call_operand.vmem [shape: f32[2,18,18,4], index: 0, kind: input, shape index: {}]   ;;  %s6700_s1 = inlined_call_operand.vmem [shape: f32[9,4,128], index: 1, kind: input, shape index: {}]   ;;  %s6701_s2 = inlined_call_operand.vmem [shape: f32[1,128], index: 2, kind: input, shape index: {}]   ;;  %s6702_s3 = inlined_call_operand.vmem [shape: f32[512,128], index: 3, kind: output, shape index: {0}]   ;;  %s6703_s4 = inlined_call_operand.vmem [shape: f32[2,1,128], index: 4, kind: output, shape index: {1}]   ;;  %s6704_s5 = inlined_call_operand.vmem [shape: f32[2,1,128], index: 5, kind: output, shape index: {2}]  }
   0x1   :  { %s5635_s20 = smov 0  }
   0x2 LB: > { %s28_s21 = sadd.s32 1, %s5595_s19  ;;  %p4043_p0 = scmp.ge.s32.totalorder %s5599_s20, 1  ;;  %s5599_s20 = sphi %s5635_s20, %s16_s20   ;;  %s5595_s19 = sphi %s5633_s19, %s6815_s19   ;;  %s5591_s18 = sphi %s5631_s18, %s6814_s18  }
   0x3   : > { %p30_p1 = scmp.ge.s32.totalorder %s28_s21, 2  ;;  %p210_p2 = scmp.lt.s32.totalorder %s5599_s20, 3 }
   0x5   : > { %s6817_s21 = smov (%p30_p1, %s28_s21), 0  ;;  %p211_p3 = pnand %p4043_p0, %p210_p2 }
   0x7   : > { %214 = sbr.rel (%p211_p3) target bundleno = 543 (0x21f), region = 32 }
   0xe   : > { %v4047_v0 = vld [vmem:[%s6700_s1 + $0x4] sm:$0xf]  ;;  %vm437_vm0 = vcmask 1043456   ;;  %v5657_v1 = vld [vmem:[%s6700_s1 + $0x10] sm:$0xf]  ;;  %p247_p4 = scmp.lt.s32.totalorder %s5591_s18, 1 }
   0xf   : > { %4844 = vmatprep.subr.msk.mxu1 %vm437_vm0, %v4047_v0  ;;  %5044 = vmatprep.subr.msk.mxu0 %vm437_vm0, %v5657_v1  ;;  %v305_v2 = vld [vmem:[%s6700_s1] sm:$0xf]  ;;  %v4312_v3 = vld [vmem:[%s6700_s1 + $0x14] sm:$0xf]  ;;  %vm340_vm1 = vcmask 31744   ;;  %s4045_s24 = sshll.u32 %s5591_s18, 5 }
  0x10   : > { %4845 = vmatpush3.msk.msra.mxu1 %vm437_vm0, %v4047_v0  ;;  %5045 = vmatpush3.msk.msra.mxu0 %vm437_vm0, %v5657_v1  ;;  %s5673_s30 = scalar_select %p247_p4, %s5591_s18, 1  ;;  %v4378_v9 = vld [vmem:[%s6700_s1 + $0x18] sm:$0xf]  ;;  %v5700_v10 = vld [vmem:[%s6700_s1 + $0x8] sm:$0xf] }
  0x11   : > { %4894 = vmatprep.subr.msk.mxu1 %vm437_vm0, %v305_v2  ;;  %5094 = vmatprep.subr.msk.mxu0 %vm437_vm0, %v4312_v3  ;;  %v5819_v28 = vld [vmem:[%s6700_s1 + $0x1c] sm:$0xf]  ;;  %v5982_v61 = vld [vmem:[%s6700_s1 + $0xc] sm:$0xf]  ;;  %p254_p5 = scmp.lt.s32.totalorder %s4045_s24, 63 }
  0x12   : > { %s5552_s6 = smul.u32 432, %s5673_s30  ;;  %s263_s8 = scalar_lea.vmem %s6703_s4, %s5673_s30 }
  0x13   : > { %s6819_s24 = smov (!%p254_p5, %s4045_s24), 63  ;;  %s268_s11 = scalar_lea.vmem %s6704_s5, %s5673_s30 }
  0x14   : > { %s5681_s9 = scalar_lea.vmem %s6699_s0, %s5552_s6  ;;  %s4046_s25 = sshll.u32 %s6819_s24, 3 }
  0x15   : > { %v306_v4 = vld [vmem:[%s5681_s9 + $0x1] sm:$0xff]  ;;  %v4214_v5 = vld [vmem:[%s5681_s9 + $0x19] sm:$0xff]  ;;  %v307_v6 = vld [vmem:[%s5681_s9 + $0x9] sm:$0xff]  ;;  %s6609_s29 = scalar_lea.vmem %s6702_s3, %s4046_s25 }
  0x16   : > { %4846 = vmatprep.mubr.msk.f32.mxu1 %vm340_vm1, %v306_v4  ;;  %5046 = vmatprep.mubr.msk.f32.mxu0 %vm340_vm1, %v4214_v5  ;;  %v4215_v7 = vld [vmem:[%s5681_s9 + $0x21] sm:$0xff]  ;;  %v5690_v8 = vld [vmem:[%s5681_s9 + $0x31] sm:$0xff]  ;;  %v5705_v11 = vld [vmem:[%s5681_s9 + $0x39] sm:$0xff] }
  0x17   : > { %4847 = vmatmul.mubr.msk.f32.vlgmr.msra.gmra.mrb[0].mxu1 %vm340_vm1, %v307_v6  ;;  %5047 = vmatmul.mubr.msk.f32.vlgmr.msra.gmra.mrb[0].mxu0 %vm340_vm1, %v4215_v7  ;;  %v5711_v12 = vld [vmem:[%s5681_s9 + $0x49] sm:$0xff]  ;;  %v5724_v13 = vld [vmem:[%s5681_s9 + $0x51] sm:$0xff]  ;;  %v5727_v14 = vld [vmem:[%s5681_s9 + $0x61] sm:$0xff] }
  0x18   : > { %4895 = vmatpush3.msk.msra.mxu1 %vm437_vm0, %v305_v2  ;;  %5095 = vmatpush3.msk.msra.mxu0 %vm437_vm0, %v4312_v3  ;;  %v5738_v15 = vld [vmem:[%s5681_s9 + $0x69] sm:$0xff]  ;;  %v5741_v16 = vld [vmem:[%s5681_s9 + $0x79] sm:$0xff]  ;;  %v5752_v17 = vld [vmem:[%s5681_s9 + $0x81] sm:$0xff] }
  0x19   : > { %4849 = vmatprep.mubr.msk.f32.mxu1 %vm340_vm1, %v4214_v5  ;;  %5049 = vmatprep.mubr.msk.f32.mxu0 %vm340_vm1, %v5690_v8  ;;  %v5755_v18 = vld [vmem:[%s5681_s9 + $0x91] sm:$0xff]  ;;  %v5766_v19 = vld [vmem:[%s5681_s9 + $0x99] sm:$0xff]  ;;  %v5769_v20 = vld [vmem:[%s5681_s9 + $0xa9] sm:$0xff] }
  0x1a   : > { %5144 = vmatprep.subr.msk.mxu0 %vm437_vm0, %v4378_v9  ;;  %4944 = vmatprep.subr.msk.mxu1 %vm437_vm0, %v5700_v10  ;;  %v5780_v21 = vld [vmem:[%s5681_s9 + $0xb1] sm:$0xff]  ;;  %v5783_v22 = vld [vmem:[%s5681_s9 + $0xc1] sm:$0xff]  ;;  %v5794_v23 = vld [vmem:[%s5681_s9 + $0xc9] sm:$0xff] }
  0x1b   : > { %4850 = vmatmul.mubr.msk.f32.gmra.mrb[2].mxu1 %vm340_vm1, %v4215_v7  ;;  %5050 = vmatmul.mubr.msk.f32.gmra.mrb[2].mxu0 %vm340_vm1, %v5705_v11  ;;  %v5797_v24 = vld [vmem:[%s5681_s9 + $0x1a] sm:$0xff]  ;;  %v5808_v25 = vld [vmem:[%s5681_s9 + $0x22] sm:$0xff]  ;;  %v5814_v27 = vld [vmem:[%s5681_s9 + $0x32] sm:$0xff] }
  0x1c   : > { %4852 = vmatprep.mubr.msk.f32.mxu1 %vm340_vm1, %v5690_v8  ;;  %5052 = vmatprep.mubr.msk.f32.mxu0 %vm340_vm1, %v5711_v12  ;;  %v5811_v26 = vld [vmem:[%s5681_s9 + $0xd9] sm:$0xff]  ;;  %v5829_v29 = vld [vmem:[%s5681_s9 + $0xe1] sm:$0xff]  ;;  %v5837_v31 = vld [vmem:[%s5681_s9 + $0xf1] sm:$0xff] }
  0x1d   : > { %6750 = vst [vmem:[#allocation2_spill] sm:$0xff] %v5829_v29  ;;  %v5832_v30 = vld [vmem:[%s5681_s9 + $0x3a] sm:$0xff]  ;;  %6751 = vst [vmem:[#allocation3_spill] sm:$0xff] %v5837_v31  ;;  %v5840_v32 = vld [vmem:[%s5681_s9 + $0x4a] sm:$0xff] }
  0x1e   : > { %v5853_v33 = vld [vmem:[%s5681_s9 + $0xf9] sm:$0xff]  ;;  %v5859_v35 = vld [vmem:[%s5681_s9 + $0x109] sm:$0xff]  ;;  %v5873_v37 = vld [vmem:[%s5681_s9 + $0x111] sm:$0xff] }
  0x1f   : > { %4853 = vmatmul.mubr.msk.f32.gmra.mrb[4].mxu1 %vm340_vm1, %v5705_v11  ;;  %5053 = vmatmul.mubr.msk.f32.gmra.mrb[4].mxu0 %vm340_vm1, %v5724_v13  ;;  %6752 = vst [vmem:[#allocation4_spill] sm:$0xff] %v5853_v33  ;;  %v5856_v34 = vld [vmem:[%s5681_s9 + $0x52] sm:$0xff]  ;;  %6753 = vst [vmem:[#allocation5_spill] sm:$0xff] %v5859_v35  ;;  %v5862_v36 = vld [vmem:[%s5681_s9 + $0x62] sm:$0xff] }
  0x20   : > { %4855 = vmatprep.mubr.msk.f32.mxu1 %vm340_vm1, %v5711_v12  ;;  %5055 = vmatprep.mubr.msk.f32.mxu0 %vm340_vm1, %v5727_v14  ;;  %6754 = vst [vmem:[#allocation6_spill] sm:$0xff] %v5873_v37  ;;  %v5876_v38 = vld [vmem:[%s5681_s9 + $0x6a] sm:$0xff]  ;;  %v5879_v39 = vld [vmem:[%s5681_s9 + $0x121] sm:$0xff]  ;;  %v5899_v43 = vld [vmem:[%s5681_s9 + $0x139] sm:$0xff] }
  0x21   : > { %6755 = vst [vmem:[#allocation7_spill] sm:$0xff] %v5879_v39  ;;  %v5882_v40 = vld [vmem:[%s5681_s9 + $0x7a] sm:$0xff]  ;;  %v5893_v41 = vld [vmem:[%s5681_s9 + $0x129] sm:$0xff]  ;;  %6757 = vst [vmem:[#allocation9_spill] sm:$0xff] %v5899_v43 }
  0x22   : > { %6756 = vst [vmem:[#allocation8_spill] sm:$0xff] %v5893_v41  ;;  %v5896_v42 = vld [vmem:[%s5681_s9 + $0x82] sm:$0xff]  ;;  %v5902_v44 = vld [vmem:[%s5681_s9 + $0x92] sm:$0xff]  ;;  %v5916_v46 = vld [vmem:[%s5681_s9 + $0x9a] sm:$0xff] }
  0x23   : > { %4856 = vmatmul.mubr.msk.f32.gmra.mrb[6].mxu1 %vm340_vm1, %v5724_v13  ;;  %5056 = vmatmul.mubr.msk.f32.gmra.mrb[6].mxu0 %vm340_vm1, %v5738_v15  ;;  %v5913_v45 = vld [vmem:[%s5681_s9 + $0x141] sm:$0xff]  ;;  %v5919_v47 = vld [vmem:[%s5681_s9 + $0x151] sm:$0xff]  ;;  %v5933_v49 = vld [vmem:[%s5681_s9 + $0x159] sm:$0xff] }
  0x24   : > { %4858 = vmatprep.mubr.msk.f32.mxu1 %vm340_vm1, %v5727_v14  ;;  %5058 = vmatprep.mubr.msk.f32.mxu0 %vm340_vm1, %v5741_v16  ;;  %6758 = vst [vmem:[#allocation10_spill] sm:$0xff] %v5913_v45  ;;  %6759 = vst [vmem:[#allocation11_spill] sm:$0xff] %v5919_v47  ;;  %v5922_v48 = vld [vmem:[%s5681_s9 + $0xaa] sm:$0xff]  ;;  %v5936_v50 = vld [vmem:[%s5681_s9 + $0xb2] sm:$0xff] }
  0x25   : > { %6760 = vst [vmem:[#allocation12_spill] sm:$0xff] %v5933_v49  ;;  %v5939_v51 = vld [vmem:[%s5681_s9 + $0x169] sm:$0xff]  ;;  %v5953_v53 = vld [vmem:[%s5681_s9 + $0x171] sm:$0xff]  ;;  %v273_v55 = vld [vmem:[%s5681_s9] sm:$0xff] }
  0x26   : > { %6761 = vst [vmem:[#allocation13_spill] sm:$0xff] %v5939_v51  ;;  %v5942_v52 = vld [vmem:[%s5681_s9 + $0xc2] sm:$0xff]  ;;  %6762 = vst [vmem:[#allocation14_spill] sm:$0xff] %v5953_v53  ;;  %v5956_v54 = vld [vmem:[%s5681_s9 + $0xca] sm:$0xff] }
  0x27   : > { %4859 = vmatmul.mubr.msk.f32.gmra.mrb[8].mxu1 %vm340_vm1, %v5738_v15  ;;  %5059 = vmatmul.mubr.msk.f32.gmra.mrb[8].mxu0 %vm340_vm1, %v5752_v17  ;;  %v5960_v56 = vld [vmem:[%s5681_s9 + $0xda] sm:$0xff]  ;;  %v274_v57 = vld [vmem:[%s5681_s9 + $0x8] sm:$0xff]  ;;  %v5977_v60 = vld [vmem:[%s5681_s9 + $0xf2] sm:$0xff] }
  0x28   : > { %4861 = vmatprep.mubr.msk.f32.mxu1 %vm340_vm1, %v5741_v16  ;;  %5061 = vmatprep.mubr.msk.f32.mxu0 %vm340_vm1, %v5755_v18  ;;  %v5971_v58 = vld [vmem:[%s5681_s9 + $0xe2] sm:$0xff]  ;;  %v5974_v59 = vld [vmem:[%s5681_s9 + $0x18] sm:$0xff]  ;;  %v6000_v0 = vld [vmem:[%s5681_s9 + $0x30] sm:$0xff] }
  0x29   : > { %6763 = vst [vmem:[#allocation15_spill] sm:$0xff] %v5974_v59  ;;  %v5992_v62 = vld [vmem:[%s5681_s9 + $0x20] sm:$0xff]  ;;  %6765 = vst [vmem:[#allocation17_spill] sm:$0xff] %v6000_v0  ;;  %v6003_v2 = vld [vmem:[%s5681_s9 + $0x10a] sm:$0xff] }
  0x2a   : > { %6764 = vst [vmem:[#allocation16_spill] sm:$0xff] %v5992_v62  ;;  %v5995_v63 = vld [vmem:[%s5681_s9 + $0xfa] sm:$0xff]  ;;  %v6019_v4 = vld [vmem:[%s5681_s9 + $0x112] sm:$0xff]  ;;  %v6022_v5 = vld [vmem:[%s5681_s9 + $0x48] sm:$0xff] }
  0x2b   : > { %4862 = vmatmul.mubr.msk.f32.gmra.mrb[10].mxu1 %vm340_vm1, %v5752_v17  ;;  %5062 = vmatmul.mubr.msk.f32.gmra.mrb[10].mxu0 %vm340_vm1, %v5766_v19  ;;  %v6016_v3 = vld [vmem:[%s5681_s9 + $0x38] sm:$0xff]  ;;  %6767 = vst [vmem:[#allocation19_spill] sm:$0xff] %v6022_v5  ;;  %v6025_v6 = vld [vmem:[%s5681_s9 + $0x122] sm:$0xff]  ;;  %v6036_v7 = vld [vmem:[%s5681_s9 + $0x50] sm:$0xff] }
  0x2c   : > { %4864 = vmatprep.mubr.msk.f32.mxu1 %vm340_vm1, %v5755_v18  ;;  %5064 = vmatprep.mubr.msk.f32.mxu0 %vm340_vm1, %v5769_v20  ;;  %6766 = vst [vmem:[#allocation18_spill] sm:$0xff] %v6016_v3  ;;  %6768 = vst [vmem:[#allocation20_spill] sm:$0xff] %v6036_v7 }
  0x2f   : > { %4865 = vmatmul.mubr.msk.f32.gmra.mrb[12].mxu1 %vm340_vm1, %v5766_v19  ;;  %5065 = vmatmul.mubr.msk.f32.gmra.mrb[12].mxu0 %vm340_vm1, %v5780_v21 }
  0x30   : > { %4867 = vmatprep.mubr.msk.f32.mxu1 %vm340_vm1, %v5769_v20  ;;  %5067 = vmatprep.mubr.msk.f32.mxu0 %vm340_vm1, %v5783_v22 }
  0x33   : > { %4868 = vmatmul.mubr.msk.f32.gmra.mrb[14].mxu1 %vm340_vm1, %v5780_v21  ;;  %5068 = vmatmul.mubr.msk.f32.gmra.mrb[14].mxu0 %vm340_vm1, %v5794_v23 }
  0x34   : > { %4870 = vmatprep.mubr.msk.f32.mxu1 %vm340_vm1, %v5783_v22  ;;  %5096 = vmatprep.mubr.msk.f32.mxu0 %vm340_vm1, %v5797_v24 }
  0x37   : > { %4871 = vmatmul.mubr.msk.f32.gmra.mrb[16].mxu1 %vm340_vm1, %v5794_v23  ;;  %5097 = vmatmul.mubr.msk.f32.vlgmr.msra.gmra.mrb[0].mxu0 %vm340_vm1, %v5808_v25 }
  0x38   : > { %5145 = vmatpush3.msk.msra.mxu0 %vm437_vm0, %v4378_v9  ;;  %4873 = vmatprep.mubr.msk.f32.mxu1 %vm340_vm1, %v5811_v26  ;;  %v6039_v9 = vld [vmem:[%s5681_s9 + $0x12a] sm:$0xff] }
  0x39   : > { %5099 = vmatprep.mubr.msk.f32.mxu0 %vm340_vm1, %v5814_v27  ;;  %5194 = vmatprep.subr.msk.mxu0 %vm437_vm0, %v5819_v28 }
  0x3b   : > { %4874 = vmatmul.mubr.msk.f32.gmra.mrb[18].mxu1 %vm340_vm1, %v5829_v29  ;;  %5100 = vmatmul.mubr.msk.f32.gmra.mrb[2].mxu0 %vm340_vm1, %v5832_v30  ;;  %v6136_v29 = vld [vmem:[%s5681_s9 + $0xd8] sm:$0xff] }
  0x3c   : > { %4876 = vmatprep.mubr.msk.f32.mxu1 %vm340_vm1, %v5837_v31  ;;  %5102 = vmatprep.mubr.msk.f32.mxu0 %vm340_vm1, %v5840_v32  ;;  %v6119_v31 = vld [vmem:[%s5681_s9 + $0x18a] sm:$0xff] }
  0x3d   : > { %6779 = vst [vmem:[#allocation31_spill] sm:$0xff] %v6119_v31 }
  0x3f   : > { %4877 = vmatmul.mubr.msk.f32.gmra.mrb[20].mxu1 %vm340_vm1, %v5853_v33  ;;  %5103 = vmatmul.mubr.msk.f32.gmra.mrb[4].mxu0 %vm340_vm1, %v5856_v34  ;;  %v6105_v33 = vld [vmem:[%s5681_s9 + $0x182] sm:$0xff] }
  0x40   : > { %4879 = vmatprep.mubr.msk.f32.mxu1 %vm340_vm1, %v5859_v35  ;;  %5105 = vmatprep.mubr.msk.f32.mxu0 %vm340_vm1, %v5862_v36  ;;  %v6102_v35 = vld [vmem:[%s5681_s9 + $0xa8] sm:$0xff]  ;;  %6777 = vst [vmem:[#allocation29_spill] sm:$0xff] %v6105_v33 }
  0x41   : > { %6776 = vst [vmem:[#allocation28_spill] sm:$0xff] %v6102_v35 }
  0x43   : > { %4880 = vmatmul.mubr.msk.f32.gmra.mrb[22].mxu1 %vm340_vm1, %v5873_v37  ;;  %5106 = vmatmul.mubr.msk.f32.gmra.mrb[6].mxu0 %vm340_vm1, %v5876_v38  ;;  %v6099_v37 = vld [vmem:[%s5681_s9 + $0x172] sm:$0xff] }
  0x44   : > { %4882 = vmatprep.mubr.msk.f32.mxu1 %vm340_vm1, %v5879_v39  ;;  %5108 = vmatprep.mubr.msk.f32.mxu0 %vm340_vm1, %v5882_v40  ;;  %v6096_v39 = vld [vmem:[%s5681_s9 + $0x98] sm:$0xff]  ;;  %6775 = vst [vmem:[#allocation27_spill] sm:$0xff] %v6099_v37 }
  0x45   : > { %6774 = vst [vmem:[#allocation26_spill] sm:$0xff] %v6096_v39 }
  0x47   : > { %4883 = vmatmul.mubr.msk.f32.gmra.mrb[24].mxu1 %vm340_vm1, %v5893_v41  ;;  %5109 = vmatmul.mubr.msk.f32.gmra.mrb[8].mxu0 %vm340_vm1, %v5896_v42  ;;  %v6085_v41 = vld [vmem:[%s5681_s9 + $0x16a] sm:$0xff] }
  0x48   : > { %4885 = vmatprep.mubr.msk.f32.mxu1 %vm340_vm1, %v5899_v43  ;;  %5111 = vmatprep.mubr.msk.f32.mxu0 %vm340_vm1, %v5902_v44  ;;  %v6082_v43 = vld [vmem:[%s5681_s9 + $0x90] sm:$0xff] }
  0x49   : > { %6773 = vst [vmem:[#allocation25_spill] sm:$0xff] %v6082_v43 }
  0x4b   : > { %4886 = vmatmul.mubr.msk.f32.gmra.mrb[26].mxu1 %vm340_vm1, %v5913_v45  ;;  %5112 = vmatmul.mubr.msk.f32.gmra.mrb[10].mxu0 %vm340_vm1, %v5916_v46  ;;  %v6079_v45 = vld [vmem:[%s5681_s9 + $0x15a] sm:$0xff] }
  0x4c   : > { %4888 = vmatprep.mubr.msk.f32.mxu1 %vm340_vm1, %v5919_v47  ;;  %5114 = vmatprep.mubr.msk.f32.mxu0 %vm340_vm1, %v5922_v48  ;;  %v6076_v47 = vld [vmem:[%s5681_s9 + $0x80] sm:$0xff] }
  0x4d   : > { %6772 = vst [vmem:[#allocation24_spill] sm:$0xff] %v6076_v47 }
  0x4f   : > { %4889 = vmatmul.mubr.msk.f32.gmra.mrb[28].mxu1 %vm340_vm1, %v5933_v49  ;;  %5115 = vmatmul.mubr.msk.f32.gmra.mrb[12].mxu0 %vm340_vm1, %v5936_v50  ;;  %v6065_v49 = vld [vmem:[%s5681_s9 + $0x152] sm:$0xff] }
  0x50   : > { %4891 = vmatprep.mubr.msk.f32.mxu1 %vm340_vm1, %v5939_v51  ;;  %5117 = vmatprep.mubr.msk.f32.mxu0 %vm340_vm1, %v5942_v52  ;;  %v6062_v51 = vld [vmem:[%s5681_s9 + $0x78] sm:$0xff] }
  0x51   : > { %6771 = vst [vmem:[#allocation23_spill] sm:$0xff] %v6062_v51 }
  0x53   : > { %4892 = vmatmul.mubr.msk.f32.gmra.mrb[30].mxu1 %vm340_vm1, %v5953_v53  ;;  %5118 = vmatmul.mubr.msk.f32.gmra.mrb[14].mxu0 %vm340_vm1, %v5956_v54  ;;  %v6059_v53 = vld [vmem:[%s5681_s9 + $0x142] sm:$0xff] }
  0x54   : > { %4896 = vmatprep.mubr.msk.f32.mxu1 %vm340_vm1, %v273_v55  ;;  %5120 = vmatprep.mubr.msk.f32.mxu0 %vm340_vm1, %v5960_v56  ;;  %v6045_v55 = vld [vmem:[%s5681_s9 + $0x13a] sm:$0xff] }
  0x57   : > { %4897 = vmatmul.mubr.msk.f32.vlgmr.msra.gmra.mrb[0].mxu1 %vm340_vm1, %v274_v57  ;;  %5121 = vmatmul.mubr.msk.f32.gmra.mrb[16].mxu0 %vm340_vm1, %v5971_v58  ;;  %v6056_v57 = vld [vmem:[%s5681_s9 + $0x68] sm:$0xff] }
  0x58   : > { %4945 = vmatpush3.msk.msra.mxu1 %vm437_vm0, %v5700_v10  ;;  %4899 = vmatprep.mubr.msk.f32.mxu1 %vm340_vm1, %v5974_v59  ;;  %v6042_v10 = vld [vmem:[%s5681_s9 + $0x60] sm:$0xff]  ;;  %6770 = vst [vmem:[#allocation22_spill] sm:$0xff] %v6056_v57 }
  0x59   : > { %5123 = vmatprep.mubr.msk.f32.mxu0 %vm340_vm1, %v5977_v60  ;;  %4994 = vmatprep.subr.msk.mxu1 %vm437_vm0, %v5982_v61  ;;  %6769 = vst [vmem:[#allocation21_spill] sm:$0xff] %v6042_v10  ;;  %v6122_v59 = vld [vmem:[%s5681_s9 + $0xc0] sm:$0xff] }
  0x5b   : > { %4900 = vmatmul.mubr.msk.f32.gmra.mrb[2].mxu1 %vm340_vm1, %v5992_v62  ;;  %5124 = vmatmul.mubr.msk.f32.gmra.mrb[18].mxu0 %vm340_vm1, %v5995_v63  ;;  %v6116_v62 = vld [vmem:[%s5681_s9 + $0xb0] sm:$0xff] }
  0x5c   : > { %4902 = vmatprep.mubr.msk.f32.mxu1 %vm340_vm1, %v6000_v0  ;;  %5126 = vmatprep.mubr.msk.f32.mxu0 %vm340_vm1, %v6003_v2  ;;  %6778 = vst [vmem:[#allocation30_spill] sm:$0xff] %v6116_v62 }
  0x5f   : > { %4903 = vmatmul.mubr.msk.f32.gmra.mrb[4].mxu1 %vm340_vm1, %v6016_v3  ;;  %5127 = vmatmul.mubr.msk.f32.gmra.mrb[20].mxu0 %vm340_vm1, %v6019_v4 }
  0x60   : > { %4905 = vmatprep.mubr.msk.f32.mxu1 %vm340_vm1, %v6022_v5  ;;  %5129 = vmatprep.mubr.msk.f32.mxu0 %vm340_vm1, %v6025_v6 }
  0x63   : > { %4906 = vmatmul.mubr.msk.f32.gmra.mrb[6].mxu1 %vm340_vm1, %v6036_v7  ;;  %5130 = vmatmul.mubr.msk.f32.gmra.mrb[22].mxu0 %vm340_vm1, %v6039_v9 }
  0x64   : > { %4908 = vmatprep.mubr.msk.f32.mxu1 %vm340_vm1, %v6042_v10  ;;  %5132 = vmatprep.mubr.msk.f32.mxu0 %vm340_vm1, %v6045_v55 }
  0x67   : > { %4909 = vmatmul.mubr.msk.f32.gmra.mrb[8].mxu1 %vm340_vm1, %v6056_v57  ;;  %5133 = vmatmul.mubr.msk.f32.gmra.mrb[24].mxu0 %vm340_vm1, %v6059_v53 }
  0x68   : > { %4911 = vmatprep.mubr.msk.f32.mxu1 %vm340_vm1, %v6062_v51  ;;  %5135 = vmatprep.mubr.msk.f32.mxu0 %vm340_vm1, %v6065_v49 }
  0x6b   : > { %4912 = vmatmul.mubr.msk.f32.gmra.mrb[10].mxu1 %vm340_vm1, %v6076_v47  ;;  %5136 = vmatmul.mubr.msk.f32.gmra.mrb[26].mxu0 %vm340_vm1, %v6079_v45 }
  0x6c   : > { %4914 = vmatprep.mubr.msk.f32.mxu1 %vm340_vm1, %v6082_v43  ;;  %5138 = vmatprep.mubr.msk.f32.mxu0 %vm340_vm1, %v6085_v41 }
  0x6f   : > { %4915 = vmatmul.mubr.msk.f32.gmra.mrb[12].mxu1 %vm340_vm1, %v6096_v39  ;;  %5139 = vmatmul.mubr.msk.f32.gmra.mrb[28].mxu0 %vm340_vm1, %v6099_v37  ;;  %v6141_v37 = vld [vmem:[%s6700_s1 + $0x20] sm:$0xf] }
  0x70   : > { %4917 = vmatprep.mubr.msk.f32.mxu1 %vm340_vm1, %v6102_v35  ;;  %5141 = vmatprep.mubr.msk.f32.mxu0 %vm340_vm1, %v6105_v33  ;;  %v6133_v33 = vld [vmem:[%s5681_s9 + $0xc8] sm:$0xff] }
  0x71   : > { %6780 = vst [vmem:[#allocation32_spill] sm:$0xff] %v6133_v33 }
  0x73   : > { %4918 = vmatmul.mubr.msk.f32.gmra.mrb[14].mxu1 %vm340_vm1, %v6116_v62  ;;  %5142 = vmatmul.mubr.msk.f32.gmra.mrb[30].mxu0 %vm340_vm1, %v6119_v31  ;;  %v6152_v31 = vld [vmem:[%s5681_s9 + $0xe0] sm:$0xff] }
  0x74   : > { %4920 = vmatprep.mubr.msk.f32.mxu1 %vm340_vm1, %v6122_v59  ;;  %5146 = vmatprep.mubr.msk.f32.mxu0 %vm340_vm1, %v6000_v0  ;;  %v6157_v0 = vld [vmem:[%s5681_s9 + $0xf0] sm:$0xff] }
  0x77   : > { %4921 = vmatmul.mubr.msk.f32.gmra.mrb[16].mxu1 %vm340_vm1, %v6133_v33  ;;  %5147 = vmatmul.mubr.msk.f32.vlgmr.msra.gmra.mrb[0].mxu0 %vm340_vm1, %v6016_v3  ;;  %v990_v3 = vld [vmem:[%s5681_s9 + $0x2] sm:$0xff] }
  0x78   : > { %5195 = vmatpush3.msk.msra.mxu0 %vm437_vm0, %v5819_v28  ;;  %4923 = vmatprep.mubr.msk.f32.mxu1 %vm340_vm1, %v6136_v29  ;;  %v6170_v28 = vld [vmem:[%s5681_s9 + $0xf8] sm:$0xff] }
  0x79   : > { %5149 = vmatprep.mubr.msk.f32.mxu0 %vm340_vm1, %v6022_v5  ;;  %5244 = vmatprep.subr.msk.mxu0 %vm437_vm0, %v6141_v37  ;;  %v6173_v5 = vld [vmem:[%s5681_s9 + $0x108] sm:$0xff] }
  0x7b   : > { %4924 = vmatmul.mubr.msk.f32.gmra.mrb[18].mxu1 %vm340_vm1, %v6152_v31  ;;  %5150 = vmatmul.mubr.msk.f32.gmra.mrb[2].mxu0 %vm340_vm1, %v6036_v7  ;;  %v6184_v7 = vld [vmem:[%s5681_s9 + $0x110] sm:$0xff] }
  0x7c   : > { %4926 = vmatprep.mubr.msk.f32.mxu1 %vm340_vm1, %v6157_v0  ;;  %5152 = vmatprep.mubr.msk.f32.mxu0 %vm340_vm1, %v6042_v10  ;;  %v6187_v10 = vld [vmem:[%s5681_s9 + $0x120] sm:$0xff] }
  0x7f   : > { %4927 = vmatmul.mubr.msk.f32.gmra.mrb[20].mxu1 %vm340_vm1, %v6170_v28  ;;  %5153 = vmatmul.mubr.msk.f32.gmra.mrb[4].mxu0 %vm340_vm1, %v6056_v57  ;;  %v6198_v57 = vld [vmem:[%s5681_s9 + $0x128] sm:$0xff] }
  0x80   : > { %4929 = vmatprep.mubr.msk.f32.mxu1 %vm340_vm1, %v6173_v5  ;;  %5155 = vmatprep.mubr.msk.f32.mxu0 %vm340_vm1, %v6062_v51  ;;  %v6201_v51 = vld [vmem:[%s5681_s9 + $0x138] sm:$0xff] }
  0x83   : > { %4930 = vmatmul.mubr.msk.f32.gmra.mrb[22].mxu1 %vm340_vm1, %v6184_v7  ;;  %5156 = vmatmul.mubr.msk.f32.gmra.mrb[6].mxu0 %vm340_vm1, %v6076_v47  ;;  %v6212_v47 = vld [vmem:[%s5681_s9 + $0x140] sm:$0xff] }
  0x84   : > { %4932 = vmatprep.mubr.msk.f32.mxu1 %vm340_vm1, %v6187_v10  ;;  %5158 = vmatprep.mubr.msk.f32.mxu0 %vm340_vm1, %v6082_v43  ;;  %v6215_v43 = vld [vmem:[%s5681_s9 + $0x150] sm:$0xff] }
  0x87   : > { %4933 = vmatmul.mubr.msk.f32.gmra.mrb[24].mxu1 %vm340_vm1, %v6198_v57  ;;  %5159 = vmatmul.mubr.msk.f32.gmra.mrb[8].mxu0 %vm340_vm1, %v6096_v39  ;;  %v6226_v39 = vld [vmem:[%s5681_s9 + $0x158] sm:$0xff] }
  0x88   : > { %4935 = vmatprep.mubr.msk.f32.mxu1 %vm340_vm1, %v6201_v51  ;;  %5161 = vmatprep.mubr.msk.f32.mxu0 %vm340_vm1, %v6102_v35  ;;  %v6229_v35 = vld [vmem:[%s5681_s9 + $0x168] sm:$0xff] }
  0x8b   : > { %4936 = vmatmul.mubr.msk.f32.gmra.mrb[26].mxu1 %vm340_vm1, %v6212_v47  ;;  %5162 = vmatmul.mubr.msk.f32.gmra.mrb[10].mxu0 %vm340_vm1, %v6116_v62  ;;  %v6240_v62 = vld [vmem:[%s5681_s9 + $0x170] sm:$0xff] }
  0x8c   : > { %4938 = vmatprep.mubr.msk.f32.mxu1 %vm340_vm1, %v6215_v43  ;;  %5164 = vmatprep.mubr.msk.f32.mxu0 %vm340_vm1, %v6122_v59 }
  0x8f   : > { %4939 = vmatmul.mubr.msk.f32.gmra.mrb[28].mxu1 %vm340_vm1, %v6226_v39  ;;  %5165 = vmatmul.mubr.msk.f32.gmra.mrb[12].mxu0 %vm340_vm1, %v6133_v33  ;;  %v991_v33 = vld [vmem:[%s5681_s9 + $0xa] sm:$0xff] }
  0x90   : > { %4941 = vmatprep.mubr.msk.f32.mxu1 %vm340_vm1, %v6229_v35  ;;  %5167 = vmatprep.mubr.msk.f32.mxu0 %vm340_vm1, %v6136_v29 }
  0x93   : > { %4942 = vmatmul.mubr.msk.f32.gmra.mrb[30].mxu1 %vm340_vm1, %v6240_v62  ;;  %5168 = vmatmul.mubr.msk.f32.gmra.mrb[14].mxu0 %vm340_vm1, %v6152_v31 }
  0x94   : > { %4946 = vmatprep.mubr.msk.f32.mxu1 %vm340_vm1, %v990_v3  ;;  %5170 = vmatprep.mubr.msk.f32.mxu0 %vm340_vm1, %v6157_v0  ;;  %v6797_v3 = vld [vmem:[#allocation22_spill] sm:$0xff] }
  0x97   : > { %4947 = vmatmul.mubr.msk.f32.vlgmr.msra.gmra.mrb[0].mxu1 %vm340_vm1, %v991_v33  ;;  %5171 = vmatmul.mubr.msk.f32.gmra.mrb[16].mxu0 %vm340_vm1, %v6170_v28  ;;  %v4376_v33 = vld [vmem:[%s5681_s9 + $0x198] sm:$0xff] }
  0x98   : > { %4995 = vmatpush3.msk.msra.mxu1 %vm437_vm0, %v5982_v61  ;;  %4949 = vmatprep.mubr.msk.f32.mxu1 %vm340_vm1, %v5797_v24  ;;  %v6295_v24 = vld [vmem:[%s5681_s9 + $0x180] sm:$0xff] }
  0x99   : > { %5173 = vmatprep.mubr.msk.f32.mxu0 %vm340_vm1, %v6173_v5  ;;  %5294 = vmatprep.subr.msk.mxu1 %vm437_vm0, %v5657_v1  ;;  %v4377_v61 = vld [vmem:[%s5681_s9 + $0x1a0] sm:$0xff] }
  0x9b   : > { %4950 = vmatmul.mubr.msk.f32.gmra.mrb[2].mxu1 %vm340_vm1, %v5808_v25  ;;  %5174 = vmatmul.mubr.msk.f32.gmra.mrb[18].mxu0 %vm340_vm1, %v6184_v7  ;;  %v6306_v25 = vld [vmem:[%s5681_s9 + $0x188] sm:$0xff] }
  0x9c   : > { %4952 = vmatprep.mubr.msk.f32.mxu1 %vm340_vm1, %v5814_v27  ;;  %5176 = vmatprep.mubr.msk.f32.mxu0 %vm340_vm1, %v6187_v10 }
  0x9f   : > { %4953 = vmatmul.mubr.msk.f32.gmra.mrb[4].mxu1 %vm340_vm1, %v5832_v30  ;;  %5177 = vmatmul.mubr.msk.f32.gmra.mrb[20].mxu0 %vm340_vm1, %v6198_v57 }
  0xa0   : > { %4955 = vmatprep.mubr.msk.f32.mxu1 %vm340_vm1, %v5840_v32  ;;  %5179 = vmatprep.mubr.msk.f32.mxu0 %vm340_vm1, %v6201_v51 }
  0xa3   : > { %4956 = vmatmul.mubr.msk.f32.gmra.mrb[6].mxu1 %vm340_vm1, %v5856_v34  ;;  %5180 = vmatmul.mubr.msk.f32.gmra.mrb[22].mxu0 %vm340_vm1, %v6212_v47 }
  0xa4   : > { %4958 = vmatprep.mubr.msk.f32.mxu1 %vm340_vm1, %v5862_v36  ;;  %5182 = vmatprep.mubr.msk.f32.mxu0 %vm340_vm1, %v6215_v43 }
  0xa7   : > { %4959 = vmatmul.mubr.msk.f32.gmra.mrb[8].mxu1 %vm340_vm1, %v5876_v38  ;;  %5183 = vmatmul.mubr.msk.f32.gmra.mrb[24].mxu0 %vm340_vm1, %v6226_v39 }
  0xa8   : > { %4961 = vmatprep.mubr.msk.f32.mxu1 %vm340_vm1, %v5882_v40  ;;  %5185 = vmatprep.mubr.msk.f32.mxu0 %vm340_vm1, %v6229_v35 }
  0xab   : > { %4962 = vmatmul.mubr.msk.f32.gmra.mrb[10].mxu1 %vm340_vm1, %v5896_v42  ;;  %5186 = vmatmul.mubr.msk.f32.gmra.mrb[26].mxu0 %vm340_vm1, %v6240_v62 }
  0xac   : > { %4964 = vmatprep.mubr.msk.f32.mxu1 %vm340_vm1, %v5902_v44  ;;  %5188 = vmatprep.mubr.msk.f32.mxu0 %vm340_vm1, %v6295_v24 }
  0xaf   : > { %4965 = vmatmul.mubr.msk.f32.gmra.mrb[12].mxu1 %vm340_vm1, %v5916_v46  ;;  %5189 = vmatmul.mubr.msk.f32.gmra.mrb[28].mxu0 %vm340_vm1, %v6306_v25 }
  0xb0   : > { %4967 = vmatprep.mubr.msk.f32.mxu1 %vm340_vm1, %v5922_v48  ;;  %5191 = vmatprep.mubr.msk.f32.mxu0 %vm340_vm1, %v4376_v33  ;;  %v6798_v33 = vld [vmem:[#allocation10_spill] sm:$0xff] }
  0xb3   : > { %4968 = vmatmul.mubr.msk.f32.gmra.mrb[14].mxu1 %vm340_vm1, %v5936_v50  ;;  %5192 = vmatmul.mubr.msk.f32.gmra.mrb[30].mxu0 %vm340_vm1, %v4377_v61  ;;  %v6799_v61 = vld [vmem:[#allocation23_spill] sm:$0xff] }
  0xb4   : > { %4970 = vmatprep.mubr.msk.f32.mxu1 %vm340_vm1, %v5942_v52  ;;  %5196 = vmatprep.mubr.msk.f32.mxu0 %vm340_vm1, %v5690_v8  ;;  %v6781_v8 = vld [vmem:[#allocation27_spill] sm:$0xff] }
  0xb7   : > { %4971 = vmatmul.mubr.msk.f32.gmra.mrb[16].mxu1 %vm340_vm1, %v5956_v54  ;;  %5197 = vmatmul.mubr.msk.f32.vlgmr.msra.gmra.mrb[0].mxu0 %vm340_vm1, %v5705_v11  ;;  %v6782_v11 = vld [vmem:[#allocation2_spill] sm:$0xff] }
  0xb8   : > { %5245 = vmatpush3.msk.msra.mxu0 %vm437_vm0, %v6141_v37  ;;  %4973 = vmatprep.mubr.msk.f32.mxu1 %vm340_vm1, %v5960_v56  ;;  %v6796_v37 = vld [vmem:[#allocation9_spill] sm:$0xff] }
  0xb9   : > { %5199 = vmatprep.mubr.msk.f32.mxu0 %vm340_vm1, %v5711_v12  ;;  %v6783_v12 = vld [vmem:[#allocation15_spill] sm:$0xff] }
  0xbb   : > { %4974 = vmatmul.mubr.msk.f32.gmra.mrb[18].mxu1 %vm340_vm1, %v5971_v58  ;;  %5200 = vmatmul.mubr.msk.f32.gmra.mrb[2].mxu0 %vm340_vm1, %v5724_v13  ;;  %v6784_v13 = vld [vmem:[#allocation3_spill] sm:$0xff] }
  0xbc   : > { %4976 = vmatprep.mubr.msk.f32.mxu1 %vm340_vm1, %v5977_v60  ;;  %5202 = vmatprep.mubr.msk.f32.mxu0 %vm340_vm1, %v5727_v14  ;;  %v6785_v14 = vld [vmem:[#allocation16_spill] sm:$0xff] }
  0xbf   : > { %4977 = vmatmul.mubr.msk.f32.gmra.mrb[20].mxu1 %vm340_vm1, %v5995_v63  ;;  %5203 = vmatmul.mubr.msk.f32.gmra.mrb[4].mxu0 %vm340_vm1, %v5738_v15  ;;  %v6786_v15 = vld [vmem:[#allocation4_spill] sm:$0xff] }
  0xc0   : > { %4979 = vmatprep.mubr.msk.f32.mxu1 %vm340_vm1, %v6003_v2  ;;  %5205 = vmatprep.mubr.msk.f32.mxu0 %vm340_vm1, %v5741_v16  ;;  %v6787_v16 = vld [vmem:[#allocation17_spill] sm:$0xff] }
  0xc3   : > { %4980 = vmatmul.mubr.msk.f32.gmra.mrb[22].mxu1 %vm340_vm1, %v6019_v4  ;;  %5206 = vmatmul.mubr.msk.f32.gmra.mrb[6].mxu0 %vm340_vm1, %v5752_v17  ;;  %v6788_v17 = vld [vmem:[#allocation5_spill] sm:$0xff] }
  0xc4   : > { %4982 = vmatprep.mubr.msk.f32.mxu1 %vm340_vm1, %v6025_v6  ;;  %5208 = vmatprep.mubr.msk.f32.mxu0 %vm340_vm1, %v5755_v18  ;;  %v6789_v18 = vld [vmem:[#allocation18_spill] sm:$0xff] }
  0xc7   : > { %4983 = vmatmul.mubr.msk.f32.gmra.mrb[24].mxu1 %vm340_vm1, %v6039_v9  ;;  %5209 = vmatmul.mubr.msk.f32.gmra.mrb[8].mxu0 %vm340_vm1, %v5766_v19  ;;  %v6790_v19 = vld [vmem:[#allocation6_spill] sm:$0xff] }
  0xc8   : > { %4985 = vmatprep.mubr.msk.f32.mxu1 %vm340_vm1, %v6045_v55  ;;  %5211 = vmatprep.mubr.msk.f32.mxu0 %vm340_vm1, %v5769_v20  ;;  %v6791_v20 = vld [vmem:[#allocation19_spill] sm:$0xff] }
  0xcb   : > { %4986 = vmatmul.mubr.msk.f32.gmra.mrb[26].mxu1 %vm340_vm1, %v6059_v53  ;;  %5212 = vmatmul.mubr.msk.f32.gmra.mrb[10].mxu0 %vm340_vm1, %v5780_v21  ;;  %v6792_v21 = vld [vmem:[#allocation7_spill] sm:$0xff] }
  0xcc   : > { %4988 = vmatprep.mubr.msk.f32.mxu1 %vm340_vm1, %v6065_v49  ;;  %5214 = vmatprep.mubr.msk.f32.mxu0 %vm340_vm1, %v5783_v22  ;;  %v6794_v22 = vld [vmem:[#allocation8_spill] sm:$0xff] }
  0xcf   : > { %4989 = vmatmul.mubr.msk.f32.gmra.mrb[28].mxu1 %vm340_vm1, %v6079_v45  ;;  %5215 = vmatmul.mubr.msk.f32.gmra.mrb[12].mxu0 %vm340_vm1, %v5794_v23  ;;  %v6795_v23 = vld [vmem:[#allocation21_spill] sm:$0xff] }
  0xd0   : > { %4991 = vmatprep.mubr.msk.f32.mxu1 %vm340_vm1, %v6085_v41  ;;  %5217 = vmatprep.mubr.msk.f32.mxu0 %vm340_vm1, %v5811_v26 }
  0xd3   : > { %4992 = vmatmul.mubr.msk.f32.gmra.mrb[30].mxu1 %vm340_vm1, %v6781_v8  ;;  %5218 = vmatmul.mubr.msk.f32.gmra.mrb[14].mxu0 %vm340_vm1, %v6782_v11  ;;  %v6808_v8 = vld [vmem:[#allocation30_spill] sm:$0xff] }
  0xd4   : > { %4996 = vmatprep.mubr.msk.f32.mxu1 %vm340_vm1, %v6783_v12  ;;  %5220 = vmatprep.mubr.msk.f32.mxu0 %vm340_vm1, %v6784_v13  ;;  %v6800_v12 = vld [vmem:[#allocation11_spill] sm:$0xff] }
  0xd7   : > { %4997 = vmatmul.mubr.msk.f32.vlgmr.msra.gmra.mrb[0].mxu1 %vm340_vm1, %v6785_v14  ;;  %5221 = vmatmul.mubr.msk.f32.gmra.mrb[16].mxu0 %vm340_vm1, %v6786_v15  ;;  %v6801_v14 = vld [vmem:[#allocation24_spill] sm:$0xff] }
  0xd8   : > { %5295 = vmatpush3.msk.msra.mxu1 %vm437_vm0, %v5657_v1  ;;  %4999 = vmatprep.mubr.msk.f32.mxu1 %vm340_vm1, %v6787_v16  ;;  %v6793_v1 = vld [vmem:[#allocation20_spill] sm:$0xff] }
  0xd9   : > { %5223 = vmatprep.mubr.msk.f32.mxu0 %vm340_vm1, %v6788_v17  ;;  %v6802_v16 = vld [vmem:[#allocation12_spill] sm:$0xff] }
  0xdb   : > { %5000 = vmatmul.mubr.msk.f32.gmra.mrb[2].mxu1 %vm340_vm1, %v6789_v18  ;;  %5224 = vmatmul.mubr.msk.f32.gmra.mrb[18].mxu0 %vm340_vm1, %v6790_v19  ;;  %v6803_v18 = vld [vmem:[#allocation25_spill] sm:$0xff] }
  0xdc   : > { %5002 = vmatprep.mubr.msk.f32.mxu1 %vm340_vm1, %v6791_v20  ;;  %5226 = vmatprep.mubr.msk.f32.mxu0 %vm340_vm1, %v6792_v21  ;;  %v6804_v20 = vld [vmem:[#allocation13_spill] sm:$0xff] }
  0xdf   : > { %5003 = vmatmul.mubr.msk.f32.gmra.mrb[4].mxu1 %vm340_vm1, %v6793_v1  ;;  %5227 = vmatmul.mubr.msk.f32.gmra.mrb[20].mxu0 %vm340_vm1, %v6794_v22  ;;  %v6433_v1 = vld [vmem:[%s5681_s9 + $0x181] sm:$0xff] }
  0xe0   : > { %5005 = vmatprep.mubr.msk.f32.mxu1 %vm340_vm1, %v6795_v23  ;;  %5229 = vmatprep.mubr.msk.f32.mxu0 %vm340_vm1, %v6796_v37  ;;  %v6805_v23 = vld [vmem:[#allocation26_spill] sm:$0xff] }
  0xe3   : > { %5006 = vmatmul.mubr.msk.f32.gmra.mrb[6].mxu1 %vm340_vm1, %v6797_v3  ;;  %5230 = vmatmul.mubr.msk.f32.gmra.mrb[22].mxu0 %vm340_vm1, %v6798_v33  ;;  %v6806_v3 = vld [vmem:[#allocation14_spill] sm:$0xff] }
  0xe4   : > { %5008 = vmatprep.mubr.msk.f32.mxu1 %vm340_vm1, %v6799_v61  ;;  %5232 = vmatprep.mubr.msk.f32.mxu0 %vm340_vm1, %v6800_v12  ;;  %v6807_v61 = vld [vmem:[#allocation28_spill] sm:$0xff] }
  0xe7   : > { %5009 = vmatmul.mubr.msk.f32.gmra.mrb[8].mxu1 %vm340_vm1, %v6801_v14  ;;  %5233 = vmatmul.mubr.msk.f32.gmra.mrb[24].mxu0 %vm340_vm1, %v6802_v16  ;;  %v6444_v14 = vld [vmem:[%s5681_s9 + $0x189] sm:$0xff] }
  0xe8   : > { %5011 = vmatprep.mubr.msk.f32.mxu1 %vm340_vm1, %v6803_v18  ;;  %5235 = vmatprep.mubr.msk.f32.mxu0 %vm340_vm1, %v6804_v20  ;;  %v4442_v18 = vld [vmem:[%s5681_s9 + $0x199] sm:$0xff] }
  0xeb   : > { %5012 = vmatmul.mubr.msk.f32.gmra.mrb[10].mxu1 %vm340_vm1, %v6805_v23  ;;  %5236 = vmatmul.mubr.msk.f32.gmra.mrb[26].mxu0 %vm340_vm1, %v6806_v3  ;;  %v4443_v23 = vld [vmem:[%s5681_s9 + $0x1a1] sm:$0xff]  ;;  %v6809_v3 = vld [vmem:[#allocation32_spill] sm:$0xff] }
  0xec   : > { %5014 = vmatprep.mubr.msk.f32.mxu1 %vm340_vm1, %v6807_v61  ;;  %5238 = vmatprep.mubr.msk.f32.mxu0 %vm340_vm1, %v6433_v1 }
  0xef   : > { %5015 = vmatmul.mubr.msk.f32.gmra.mrb[12].mxu1 %vm340_vm1, %v6808_v8  ;;  %5239 = vmatmul.mubr.msk.f32.gmra.mrb[28].mxu0 %vm340_vm1, %v6444_v14 }
  0xf0   : > { %5017 = vmatprep.mubr.msk.f32.mxu1 %vm340_vm1, %v6122_v59  ;;  %5241 = vmatprep.mubr.msk.f32.mxu0 %vm340_vm1, %v4442_v18 }
  0xf3   : > { %5018 = vmatmul.mubr.msk.f32.gmra.mrb[14].mxu1 %vm340_vm1, %v6809_v3  ;;  %5242 = vmatmul.mubr.msk.f32.gmra.mrb[30].mxu0 %vm340_vm1, %v4443_v23 }
  0xf4   : > { %5020 = vmatprep.mubr.msk.f32.mxu1 %vm340_vm1, %v6136_v29  ;;  %5246 = vmatprep.mubr.msk.f32.mxu0 %vm340_vm1, %v5814_v27  ;;  %v6811_v27 = vld [vmem:[#allocation29_spill] sm:$0xff] }
  0xf5   : > { %v4508_v29 = vld [vmem:[%s5681_s9 + $0x19a] sm:$0xff] }
  0xf7   : > { %5021 = vmatmul.mubr.msk.f32.gmra.mrb[16].mxu1 %vm340_vm1, %v6152_v31  ;;  %5247 = vmatmul.mubr.msk.f32.vlgmr.msra.gmra.mrb[0].mxu0 %vm340_vm1, %v5832_v30  ;;  %v6812_v30 = vld [vmem:[#allocation14_spill] sm:$0xff]  ;;  %v6813_v31 = vld [vmem:[#allocation31_spill] sm:$0xff] }
  0xf8   : > { %5023 = vmatprep.mubr.msk.f32.mxu1 %vm340_vm1, %v6157_v0  ;;  %5249 = vmatprep.mubr.msk.f32.mxu0 %vm340_vm1, %v5840_v32  ;;  %v4509_v32 = vld [vmem:[%s5681_s9 + $0x1a2] sm:$0xff] }
  0xfb   : > { %5024 = vmatmul.mubr.msk.f32.gmra.mrb[18].mxu1 %vm340_vm1, %v6170_v28  ;;  %5250 = vmatmul.mubr.msk.f32.gmra.mrb[2].mxu0 %vm340_vm1, %v5856_v34 }
  0xfc   : > { %5026 = vmatprep.mubr.msk.f32.mxu1 %vm340_vm1, %v6173_v5  ;;  %5252 = vmatprep.mubr.msk.f32.mxu0 %vm340_vm1, %v5862_v36 }
  0xff   : > { %5027 = vmatmul.mubr.msk.f32.gmra.mrb[20].mxu1 %vm340_vm1, %v6184_v7  ;;  %5253 = vmatmul.mubr.msk.f32.gmra.mrb[4].mxu0 %vm340_vm1, %v5876_v38 }
 0x100   : > { %5029 = vmatprep.mubr.msk.f32.mxu1 %vm340_vm1, %v6187_v10  ;;  %5255 = vmatprep.mubr.msk.f32.mxu0 %vm340_vm1, %v5882_v40 }
 0x103   : > { %5030 = vmatmul.mubr.msk.f32.gmra.mrb[22].mxu1 %vm340_vm1, %v6198_v57  ;;  %5256 = vmatmul.mubr.msk.f32.gmra.mrb[6].mxu0 %vm340_vm1, %v5896_v42 }
 0x104   : > { %5032 = vmatprep.mubr.msk.f32.mxu1 %vm340_vm1, %v6201_v51  ;;  %5258 = vmatprep.mubr.msk.f32.mxu0 %vm340_vm1, %v5902_v44 }
 0x107   : > { %5033 = vmatmul.mubr.msk.f32.gmra.mrb[24].mxu1 %vm340_vm1, %v6212_v47  ;;  %5259 = vmatmul.mubr.msk.f32.gmra.mrb[8].mxu0 %vm340_vm1, %v5916_v46 }
 0x108   : > { %5035 = vmatprep.mubr.msk.f32.mxu1 %vm340_vm1, %v6215_v43  ;;  %5261 = vmatprep.mubr.msk.f32.mxu0 %vm340_vm1, %v5922_v48 }
 0x10b   : > { %5036 = vmatmul.mubr.msk.f32.gmra.mrb[26].mxu1 %vm340_vm1, %v6226_v39  ;;  %5262 = vmatmul.mubr.msk.f32.gmra.mrb[10].mxu0 %vm340_vm1, %v5936_v50 }
 0x10c   : > { %5038 = vmatprep.mubr.msk.f32.mxu1 %vm340_vm1, %v6229_v35  ;;  %5264 = vmatprep.mubr.msk.f32.mxu0 %vm340_vm1, %v5942_v52  ;;  %v6604_v52 = vld [vmem:[%s6701_s2] ss:$0 sm:$0xff] }
 0x10f   : > { %5039 = vmatmul.mubr.msk.f32.gmra.mrb[28].mxu1 %vm340_vm1, %v6240_v62  ;;  %5265 = vmatmul.mubr.msk.f32.gmra.mrb[12].mxu0 %vm340_vm1, %v5956_v54 }
 0x110   : > { %5041 = vmatprep.mubr.msk.f32.mxu1 %vm340_vm1, %v6295_v24  ;;  %5267 = vmatprep.mubr.msk.f32.mxu0 %vm340_vm1, %v5960_v56 }
 0x113   : > { %5042 = vmatmul.mubr.msk.f32.gmra.mrb[30].mxu1 %vm340_vm1, %v6306_v25  ;;  %5268 = vmatmul.mubr.msk.f32.gmra.mrb[14].mxu0 %vm340_vm1, %v5971_v58 }
 0x114   : > { %5070 = vmatprep.mubr.msk.f32.mxu1 %vm340_vm1, %v5811_v26  ;;  %5270 = vmatprep.mubr.msk.f32.mxu0 %vm340_vm1, %v5977_v60  ;;  %v6810_v26 = vld [vmem:[#allocation27_spill] sm:$0xff] }
 0x117   : > { %5071 = vmatmul.mubr.msk.f32.vlgmr.msra.gmra.mrb[16].mxu1 %vm340_vm1, %v6782_v11  ;;  %5271 = vmatmul.mubr.msk.f32.gmra.mrb[16].mxu0 %vm340_vm1, %v5995_v63 }
 0x118   : > { %5073 = vmatprep.mubr.msk.f32.mxu1 %vm340_vm1, %v6784_v13  ;;  %5273 = vmatprep.mubr.msk.f32.mxu0 %vm340_vm1, %v6003_v2 }
 0x11b   : > { %5074 = vmatmul.mubr.msk.f32.gmra.mrb[18].mxu1 %vm340_vm1, %v6786_v15  ;;  %5274 = vmatmul.mubr.msk.f32.gmra.mrb[18].mxu0 %vm340_vm1, %v6019_v4 }
 0x11c   : > { %5076 = vmatprep.mubr.msk.f32.mxu1 %vm340_vm1, %v6788_v17  ;;  %5276 = vmatprep.mubr.msk.f32.mxu0 %vm340_vm1, %v6025_v6 }
 0x11f   : > { %5077 = vmatmul.mubr.msk.f32.gmra.mrb[20].mxu1 %vm340_vm1, %v6790_v19  ;;  %5277 = vmatmul.mubr.msk.f32.gmra.mrb[20].mxu0 %vm340_vm1, %v6039_v9 }
 0x120   : > { %5079 = vmatprep.mubr.msk.f32.mxu1 %vm340_vm1, %v6792_v21  ;;  %5279 = vmatprep.mubr.msk.f32.mxu0 %vm340_vm1, %v6045_v55 }
 0x123   : > { %5080 = vmatmul.mubr.msk.f32.gmra.mrb[22].mxu1 %vm340_vm1, %v6794_v22  ;;  %5280 = vmatmul.mubr.msk.f32.gmra.mrb[22].mxu0 %vm340_vm1, %v6059_v53 }
 0x124   : > { %5082 = vmatprep.mubr.msk.f32.mxu1 %vm340_vm1, %v6796_v37  ;;  %5282 = vmatprep.mubr.msk.f32.mxu0 %vm340_vm1, %v6065_v49 }
 0x127   : > { %5083 = vmatmul.mubr.msk.f32.gmra.mrb[24].mxu1 %vm340_vm1, %v6798_v33  ;;  %5283 = vmatmul.mubr.msk.f32.gmra.mrb[24].mxu0 %vm340_vm1, %v6079_v45 }
 0x128   : > { %5085 = vmatprep.mubr.msk.f32.mxu1 %vm340_vm1, %v6800_v12  ;;  %5285 = vmatprep.mubr.msk.f32.mxu0 %vm340_vm1, %v6085_v41 }
 0x12b   : > { %5086 = vmatmul.mubr.msk.f32.gmra.mrb[26].mxu1 %vm340_vm1, %v6802_v16  ;;  %5286 = vmatmul.mubr.msk.f32.gmra.mrb[26].mxu0 %vm340_vm1, %v6810_v26 }
 0x12c   : > { %5088 = vmatprep.mubr.msk.f32.mxu1 %vm340_vm1, %v6804_v20  ;;  %5288 = vmatprep.mubr.msk.f32.mxu0 %vm340_vm1, %v6811_v27 }
 0x12f   : > { %5089 = vmatmul.mubr.msk.f32.gmra.mrb[28].mxu1 %vm340_vm1, %v6812_v30  ;;  %5289 = vmatmul.mubr.msk.f32.gmra.mrb[28].mxu0 %vm340_vm1, %v6813_v31 }
 0x130   : > { %5091 = vmatprep.mubr.msk.f32.mxu1 %vm340_vm1, %v6433_v1  ;;  %5291 = vmatprep.mubr.msk.f32.mxu0 %vm340_vm1, %v4508_v29 }
 0x133   : > { %5092 = vmatmul.mubr.msk.f32.gmra.mrb[30].mxu1 %vm340_vm1, %v6444_v14  ;;  %5292 = vmatmul.mubr.msk.f32.gmra.mrb[30].mxu0 %vm340_vm1, %v4509_v32 }
 0x1aa   : > { %v4998_v34 = vpop.f32.mrb[0].mxu1 }
 0x1ab   : > { %v1582_v35 = vpop.f32.mrb[1].mxu1 }
 0x1ae   : > { %v5001_v36 = vpop.f32.mrb[2].mxu1 }
 0x1af   : > { %v1592_v38 = vpop.f32.mrb[3].mxu1 }
 0x1b2   : > { %v5004_v39 = vpop.f32.mrb[4].mxu1 }
 0x1b3   : > { %v1602_v40 = vpop.f32.mrb[5].mxu1 }
 0x1b6   : > { %v5007_v41 = vpop.f32.mrb[6].mxu1 }
 0x1b7   : > { %v1612_v42 = vpop.f32.mrb[7].mxu1 }
 0x1ba   : > { %v5010_v43 = vpop.f32.mrb[8].mxu1 }
 0x1bb   : > { %v6586_v44 = vpop.f32.mrb[9].mxu1 }
 0x1be   : > { %v6588_v45 = vpop.f32.mrb[10].mxu1 }
 0x1bf   : > { %v6591_v46 = vpop.f32.mrb[11].mxu1 }
 0x1c2   : > { %v6593_v47 = vpop.f32.mrb[12].mxu1 }
 0x1c3   : > { %v6595_v48 = vpop.f32.mrb[13].mxu1 }
 0x1c6   : > { %v6597_v49 = vpop.f32.mrb[14].mxu1 }
 0x1c7   : > { %v6599_v50 = vpop.f32.mrb[15].mxu1 }
 0x1ca   : > { %v5248_v51 = vpop.f32.mrb[0].mxu0 }
 0x1cb   : > { %v5296_v53 = vadd.f32 %v5248_v51, %v4998_v34  ;;  %v3535_v54 = vpop.f32.mrb[1].mxu0 }
 0x1cc   : > { %v5297_v56 = vadd.f32 %v3535_v54, %v1582_v35 }
 0x1cd   : > { %v3734_v58 = vadd.f32 %v5296_v53, %v6604_v52 }
 0x1ce   : > { %v3733_v59 = vadd.f32 %v5297_v56, %v6604_v52  ;;  %v5251_v60 = vpop.f32.mrb[2].mxu0 }
 0x1cf   : > { %3766 = vst [vmem:[%s6609_s29 + $0x8] sm:$0xff] %v3734_v58  ;;  %v3836_v62 = vmul.f32 %v3734_v58, %v3734_v58  ;;  %v5298_v63 = vadd.f32 %v5251_v60, %v5001_v36  ;;  %v3545_v0 = vpop.f32.mrb[3].mxu0 }
 0x1d0   : > { %3765 = vst [vmem:[%s6609_s29] sm:$0xff] %v3733_v59  ;;  %v3797_v2 = vadd.f32 %v3734_v58, %v3733_v59  ;;  %v3835_v4 = vmul.f32 %v3733_v59, %v3733_v59  ;;  %v5299_v5 = vadd.f32 %v3545_v0, %v1592_v38 }
 0x1d1   : > { %v3736_v6 = vadd.f32 %v5298_v63, %v6604_v52 }
 0x1d2   : > { %v3867_v7 = vadd.f32 %v3836_v62, %v3835_v4  ;;  %v3735_v9 = vadd.f32 %v5299_v5, %v6604_v52  ;;  %v5254_v10 = vpop.f32.mrb[4].mxu0 }
 0x1d3   : > { %3768 = vst [vmem:[%s6609_s29 + $0x18] sm:$0xff] %v3736_v6  ;;  %v5300_v55 = vadd.f32 %v5254_v10, %v5004_v39  ;;  %v3555_v57 = vpop.f32.mrb[5].mxu0  ;;  %v3838_v11 = vmul.f32 %v3736_v6, %v3736_v6 }
 0x1d4   : > { %3767 = vst [vmem:[%s6609_s29 + $0x10] sm:$0xff] %v3735_v9  ;;  %v3798_v28 = vadd.f32 %v3797_v2, %v3735_v9  ;;  %v3837_v24 = vmul.f32 %v3735_v9, %v3735_v9  ;;  %v5301_v25 = vadd.f32 %v3555_v57, %v1602_v40 }
 0x1d5   : > { %v3738_v8 = vadd.f32 %v5300_v55, %v6604_v52 }
 0x1d6   : > { %v3868_v13 = vadd.f32 %v3867_v7, %v3837_v24  ;;  %v3737_v15 = vadd.f32 %v5301_v25, %v6604_v52  ;;  %v3799_v17 = vadd.f32 %v3798_v28, %v3736_v6  ;;  %v5257_v19 = vpop.f32.mrb[6].mxu0 }
 0x1d7   : > { %3770 = vst [vmem:[%s6609_s29 + $0x28] sm:$0xff] %v3738_v8  ;;  %v5302_v21 = vadd.f32 %v5257_v19, %v5007_v41  ;;  %v3565_v22 = vpop.f32.mrb[7].mxu0  ;;  %v3840_v1 = vmul.f32 %v3738_v8, %v3738_v8 }
 0x1d8   : > { %3769 = vst [vmem:[%s6609_s29 + $0x20] sm:$0xff] %v3737_v15  ;;  %v3800_v37 = vadd.f32 %v3799_v17, %v3737_v15  ;;  %v3839_v33 = vmul.f32 %v3737_v15, %v3737_v15  ;;  %v3869_v12 = vadd.f32 %v3868_v13, %v3838_v11  ;;  %v5303_v16 = vadd.f32 %v3565_v22, %v1612_v42 }
 0x1d9   : > { %v3740_v20 = vadd.f32 %v5302_v21, %v6604_v52 }
 0x1da   : > { %v3870_v3 = vadd.f32 %v3869_v12, %v3839_v33  ;;  %v3739_v61 = vadd.f32 %v5303_v16, %v6604_v52  ;;  %v3801_v14 = vadd.f32 %v3800_v37, %v3738_v8  ;;  %v5260_v18 = vpop.f32.mrb[8].mxu0 }
 0x1db   : > { %3772 = vst [vmem:[%s6609_s29 + $0x38] sm:$0xff] %v3740_v20  ;;  %v5304_v23 = vadd.f32 %v5260_v18, %v5010_v43  ;;  %v3575_v26 = vpop.f32.mrb[9].mxu0  ;;  %v3842_v34 = vmul.f32 %v3740_v20, %v3740_v20 }
 0x1dc   : > { %3771 = vst [vmem:[%s6609_s29 + $0x30] sm:$0xff] %v3739_v61  ;;  %v3802_v27 = vadd.f32 %v3801_v14, %v3739_v61  ;;  %v3841_v29 = vmul.f32 %v3739_v61, %v3739_v61  ;;  %v3871_v30 = vadd.f32 %v3870_v3, %v3840_v1  ;;  %v5305_v31 = vadd.f32 %v3575_v26, %v6586_v44 }
 0x1dd   : > { %v3742_v32 = vadd.f32 %v5304_v23, %v6604_v52 }
 0x1de   : > { %v3872_v35 = vadd.f32 %v3871_v30, %v3841_v29  ;;  %v3741_v36 = vadd.f32 %v5305_v31, %v6604_v52  ;;  %v3803_v38 = vadd.f32 %v3802_v27, %v3740_v20  ;;  %v5263_v39 = vpop.f32.mrb[10].mxu0 }
 0x1df   : > { %3774 = vst [vmem:[%s6609_s29 + $0x48] sm:$0xff] %v3742_v32  ;;  %v5306_v40 = vadd.f32 %v5263_v39, %v6588_v45  ;;  %v3585_v41 = vpop.f32.mrb[11].mxu0  ;;  %v3844_v54 = vmul.f32 %v3742_v32, %v3742_v32 }
 0x1e0   : > { %3773 = vst [vmem:[%s6609_s29 + $0x40] sm:$0xff] %v3741_v36  ;;  %v3804_v42 = vadd.f32 %v3803_v38, %v3741_v36  ;;  %v3843_v43 = vmul.f32 %v3741_v36, %v3741_v36  ;;  %v3873_v51 = vadd.f32 %v3872_v35, %v3842_v34  ;;  %v5307_v44 = vadd.f32 %v3585_v41, %v6591_v46 }
 0x1e1   : > { %v3744_v53 = vadd.f32 %v5306_v40, %v6604_v52 }
 0x1e2   : > { %v3874_v56 = vadd.f32 %v3873_v51, %v3843_v43  ;;  %v3743_v58 = vadd.f32 %v5307_v44, %v6604_v52  ;;  %v3805_v59 = vadd.f32 %v3804_v42, %v3742_v32  ;;  %v5266_v60 = vpop.f32.mrb[12].mxu0 }
 0x1e3   : > { %3776 = vst [vmem:[%s6609_s29 + $0x58] sm:$0xff] %v3744_v53  ;;  %v5308_v45 = vadd.f32 %v5266_v60, %v6593_v47  ;;  %v3595_v62 = vpop.f32.mrb[13].mxu0  ;;  %v3846_v5 = vmul.f32 %v3744_v53, %v3744_v53 }
 0x1e4   : > { %3775 = vst [vmem:[%s6609_s29 + $0x50] sm:$0xff] %v3743_v58  ;;  %v3806_v63 = vadd.f32 %v3805_v59, %v3743_v58  ;;  %v3845_v0 = vmul.f32 %v3743_v58, %v3743_v58  ;;  %v3875_v2 = vadd.f32 %v3874_v56, %v3844_v54  ;;  %v5309_v46 = vadd.f32 %v3595_v62, %v6595_v48 }
 0x1e5   : > { %v3746_v4 = vadd.f32 %v5308_v45, %v6604_v52 }
 0x1e6   : > { %v3876_v6 = vadd.f32 %v3875_v2, %v3845_v0  ;;  %v3745_v7 = vadd.f32 %v5309_v46, %v6604_v52  ;;  %v3807_v9 = vadd.f32 %v3806_v63, %v3744_v53  ;;  %v5269_v10 = vpop.f32.mrb[14].mxu0 }
 0x1e7   : > { %3778 = vst [vmem:[%s6609_s29 + $0x68] sm:$0xff] %v3746_v4  ;;  %v5310_v47 = vadd.f32 %v5269_v10, %v6597_v49  ;;  %v3605_v55 = vpop.f32.mrb[15].mxu0  ;;  %v3848_v8 = vmul.f32 %v3746_v4, %v3746_v4 }
 0x1e8   : > { %3777 = vst [vmem:[%s6609_s29 + $0x60] sm:$0xff] %v3745_v7  ;;  %v3808_v57 = vadd.f32 %v3807_v9, %v3745_v7  ;;  %v3847_v28 = vmul.f32 %v3745_v7, %v3745_v7  ;;  %v3877_v24 = vadd.f32 %v3876_v6, %v3846_v5  ;;  %v5311_v48 = vadd.f32 %v3605_v55, %v6599_v50 }
 0x1e9   : > { %v3748_v25 = vadd.f32 %v5310_v47, %v6604_v52 }
 0x1ea   : > { %v3878_v11 = vadd.f32 %v3877_v24, %v3847_v28  ;;  %v3747_v13 = vadd.f32 %v5311_v48, %v6604_v52  ;;  %v3809_v15 = vadd.f32 %v3808_v57, %v3746_v4  ;;  %v5072_v17 = vpop.f32.mrb[16].mxu1  ;;  %v5272_v19 = vpop.f32.mrb[16].mxu0 }
 0x1eb   : > { %3780 = vst [vmem:[%s6609_s29 + $0x78] sm:$0xff] %v3748_v25  ;;  %v5312_v49 = vadd.f32 %v5272_v19, %v5072_v17  ;;  %v2052_v21 = vpop.f32.mrb[17].mxu1  ;;  %v3615_v22 = vpop.f32.mrb[17].mxu0  ;;  %v3850_v20 = vmul.f32 %v3748_v25, %v3748_v25 }
 0x1ec   : > { %3779 = vst [vmem:[%s6609_s29 + $0x70] sm:$0xff] %v3747_v13  ;;  %v3810_v37 = vadd.f32 %v3809_v15, %v3747_v13  ;;  %v3849_v33 = vmul.f32 %v3747_v13, %v3747_v13  ;;  %v3879_v12 = vadd.f32 %v3878_v11, %v3848_v8  ;;  %v5313_v50 = vadd.f32 %v3615_v22, %v2052_v21 }
 0x1ed   : > { %v3750_v16 = vadd.f32 %v5312_v49, %v6604_v52 }
 0x1ee   : > { %v3880_v1 = vadd.f32 %v3879_v12, %v3849_v33  ;;  %v3749_v3 = vadd.f32 %v5313_v50, %v6604_v52  ;;  %v3811_v61 = vadd.f32 %v3810_v37, %v3748_v25  ;;  %v5075_v14 = vpop.f32.mrb[18].mxu1  ;;  %v5275_v18 = vpop.f32.mrb[18].mxu0 }
 0x1ef   : > { %3782 = vst [vmem:[%s6609_s29 + $0x88] sm:$0xff] %v3750_v16  ;;  %v5314_v23 = vadd.f32 %v5275_v18, %v5075_v14  ;;  %v2062_v26 = vpop.f32.mrb[19].mxu1  ;;  %v3625_v27 = vpop.f32.mrb[19].mxu0  ;;  %v3852_v35 = vmul.f32 %v3750_v16, %v3750_v16 }
 0x1f0   : > { %3781 = vst [vmem:[%s6609_s29 + $0x80] sm:$0xff] %v3749_v3  ;;  %v3812_v29 = vadd.f32 %v3811_v61, %v3749_v3  ;;  %v3851_v30 = vmul.f32 %v3749_v3, %v3749_v3  ;;  %v3881_v31 = vadd.f32 %v3880_v1, %v3850_v20  ;;  %v5315_v32 = vadd.f32 %v3625_v27, %v2062_v26 }
 0x1f1   : > { %v3752_v34 = vadd.f32 %v5314_v23, %v6604_v52 }
 0x1f2   : > { %v3882_v36 = vadd.f32 %v3881_v31, %v3851_v30  ;;  %v3751_v38 = vadd.f32 %v5315_v32, %v6604_v52  ;;  %v3813_v39 = vadd.f32 %v3812_v29, %v3750_v16  ;;  %v5078_v40 = vpop.f32.mrb[20].mxu1  ;;  %v5278_v41 = vpop.f32.mrb[20].mxu0 }
 0x1f3   : > { %3784 = vst [vmem:[%s6609_s29 + $0x98] sm:$0xff] %v3752_v34  ;;  %v5316_v42 = vadd.f32 %v5278_v41, %v5078_v40  ;;  %v2072_v43 = vpop.f32.mrb[21].mxu1  ;;  %v3635_v51 = vpop.f32.mrb[21].mxu0  ;;  %v3854_v59 = vmul.f32 %v3752_v34, %v3752_v34 }
 0x1f4   : > { %3783 = vst [vmem:[%s6609_s29 + $0x90] sm:$0xff] %v3751_v38  ;;  %v3814_v44 = vadd.f32 %v3813_v39, %v3751_v38  ;;  %v3853_v53 = vmul.f32 %v3751_v38, %v3751_v38  ;;  %v3883_v54 = vadd.f32 %v3882_v36, %v3852_v35  ;;  %v5317_v56 = vadd.f32 %v3635_v51, %v2072_v43 }
 0x1f5   : > { %v3754_v58 = vadd.f32 %v5316_v42, %v6604_v52 }
 0x1f6   : > { %v3884_v60 = vadd.f32 %v3883_v54, %v3853_v53  ;;  %v3753_v45 = vadd.f32 %v5317_v56, %v6604_v52  ;;  %v3815_v62 = vadd.f32 %v3814_v44, %v3752_v34  ;;  %v5081_v63 = vpop.f32.mrb[22].mxu1  ;;  %v5281_v0 = vpop.f32.mrb[22].mxu0 }
 0x1f7   : > { %3786 = vst [vmem:[%s6609_s29 + $0xa8] sm:$0xff] %v3754_v58  ;;  %v5318_v2 = vadd.f32 %v5281_v0, %v5081_v63  ;;  %v2082_v46 = vpop.f32.mrb[23].mxu1  ;;  %v3645_v4 = vpop.f32.mrb[23].mxu0  ;;  %v3856_v47 = vmul.f32 %v3754_v58, %v3754_v58 }
 0x1f8   : > { %3785 = vst [vmem:[%s6609_s29 + $0xa0] sm:$0xff] %v3753_v45  ;;  %v3816_v5 = vadd.f32 %v3815_v62, %v3753_v45  ;;  %v3855_v6 = vmul.f32 %v3753_v45, %v3753_v45  ;;  %v3885_v7 = vadd.f32 %v3884_v60, %v3854_v59  ;;  %v5319_v9 = vadd.f32 %v3645_v4, %v2082_v46 }
 0x1f9   : > { %v3756_v10 = vadd.f32 %v5318_v2, %v6604_v52 }
 0x1fa   : > { %v3886_v55 = vadd.f32 %v3885_v7, %v3855_v6  ;;  %v3755_v57 = vadd.f32 %v5319_v9, %v6604_v52  ;;  %v3817_v28 = vadd.f32 %v3816_v5, %v3754_v58  ;;  %v5084_v24 = vpop.f32.mrb[24].mxu1  ;;  %v5284_v48 = vpop.f32.mrb[24].mxu0 }
 0x1fb   : > { %3788 = vst [vmem:[%s6609_s29 + $0xb8] sm:$0xff] %v3756_v10  ;;  %v5320_v25 = vadd.f32 %v5284_v48, %v5084_v24  ;;  %v2092_v8 = vpop.f32.mrb[25].mxu1  ;;  %v3655_v11 = vpop.f32.mrb[25].mxu0  ;;  %v3858_v21 = vmul.f32 %v3756_v10, %v3756_v10 }
 0x1fc   : > { %3787 = vst [vmem:[%s6609_s29 + $0xb0] sm:$0xff] %v3755_v57  ;;  %v3818_v13 = vadd.f32 %v3817_v28, %v3755_v57  ;;  %v3857_v15 = vmul.f32 %v3755_v57, %v3755_v57  ;;  %v3887_v17 = vadd.f32 %v3886_v55, %v3856_v47  ;;  %v5321_v19 = vadd.f32 %v3655_v11, %v2092_v8 }
 0x1fd   : > { %v3758_v49 = vadd.f32 %v5320_v25, %v6604_v52 }
 0x1fe   : > { %v3888_v22 = vadd.f32 %v3887_v17, %v3857_v15  ;;  %v3757_v37 = vadd.f32 %v5321_v19, %v6604_v52  ;;  %v3819_v33 = vadd.f32 %v3818_v13, %v3756_v10  ;;  %v5087_v12 = vpop.f32.mrb[26].mxu1  ;;  %v5287_v50 = vpop.f32.mrb[26].mxu0 }
 0x1ff   : > { %3790 = vst [vmem:[%s6609_s29 + $0xc8] sm:$0xff] %v3758_v49  ;;  %v5322_v16 = vadd.f32 %v5287_v50, %v5087_v12  ;;  %v2102_v20 = vpop.f32.mrb[27].mxu1  ;;  %v3665_v1 = vpop.f32.mrb[27].mxu0  ;;  %v3860_v26 = vmul.f32 %v3758_v49, %v3758_v49 }
 0x200   : > { %3789 = vst [vmem:[%s6609_s29 + $0xc0] sm:$0xff] %v3757_v37  ;;  %v3820_v3 = vadd.f32 %v3819_v33, %v3757_v37  ;;  %v3859_v61 = vmul.f32 %v3757_v37, %v3757_v37  ;;  %v3889_v14 = vadd.f32 %v3888_v22, %v3858_v21  ;;  %v5323_v18 = vadd.f32 %v3665_v1, %v2102_v20 }
 0x201   : > { %v3760_v23 = vadd.f32 %v5322_v16, %v6604_v52 }
 0x202   : > { %v3890_v27 = vadd.f32 %v3889_v14, %v3859_v61  ;;  %v3759_v29 = vadd.f32 %v5323_v18, %v6604_v52  ;;  %v3821_v30 = vadd.f32 %v3820_v3, %v3758_v49  ;;  %v5090_v31 = vpop.f32.mrb[28].mxu1  ;;  %v5290_v32 = vpop.f32.mrb[28].mxu0 }
 0x203   : > { %3792 = vst [vmem:[%s6609_s29 + $0xd8] sm:$0xff] %v3760_v23  ;;  %v5324_v34 = vadd.f32 %v5290_v32, %v5090_v31  ;;  %v2112_v35 = vpop.f32.mrb[29].mxu1  ;;  %v3675_v36 = vpop.f32.mrb[29].mxu0  ;;  %v3862_v43 = vmul.f32 %v3760_v23, %v3760_v23 }
 0x204   : > { %3791 = vst [vmem:[%s6609_s29 + $0xd0] sm:$0xff] %v3759_v29  ;;  %v3822_v38 = vadd.f32 %v3821_v30, %v3759_v29  ;;  %v3861_v39 = vmul.f32 %v3759_v29, %v3759_v29  ;;  %v3891_v40 = vadd.f32 %v3890_v27, %v3860_v26  ;;  %v5325_v41 = vadd.f32 %v3675_v36, %v2112_v35 }
 0x205   : > { %v3762_v42 = vadd.f32 %v5324_v34, %v6604_v52 }
 0x206   : > { %v3892_v51 = vadd.f32 %v3891_v40, %v3861_v39  ;;  %v3761_v44 = vadd.f32 %v5325_v41, %v6604_v52  ;;  %v3823_v53 = vadd.f32 %v3822_v38, %v3760_v23  ;;  %v5093_v54 = vpop.f32.mrb[30].mxu1  ;;  %v5293_v56 = vpop.f32.mrb[30].mxu0 }
 0x207   : > { %3794 = vst [vmem:[%s6609_s29 + $0xe8] sm:$0xff] %v3762_v42  ;;  %v5326_v58 = vadd.f32 %v5293_v56, %v5093_v54  ;;  %v2122_v59 = vpop.f32.mrb[31].mxu1  ;;  %v3685_v60 = vpop.f32.mrb[31].mxu0  ;;  %v3864_v46 = vmul.f32 %v3762_v42, %v3762_v42 }
 0x208   : > { %3793 = vst [vmem:[%s6609_s29 + $0xe0] sm:$0xff] %v3761_v44  ;;  %v3824_v45 = vadd.f32 %v3823_v53, %v3761_v44  ;;  %v3863_v62 = vmul.f32 %v3761_v44, %v3761_v44  ;;  %v3893_v63 = vadd.f32 %v3892_v51, %v3862_v43  ;;  %v5327_v0 = vadd.f32 %v3685_v60, %v2122_v59 }
 0x209   : > { %v3764_v2 = vadd.f32 %v5326_v58, %v6604_v52 }
 0x20a   : > { %v3894_v4 = vadd.f32 %v3893_v63, %v3863_v62  ;;  %v3763_v5 = vadd.f32 %v5327_v0, %v6604_v52  ;;  %v3825_v6 = vadd.f32 %v3824_v45, %v3762_v42 }
 0x20b   : > { %3796 = vst [vmem:[%s6609_s29 + $0xf8] sm:$0xff] %v3764_v2  ;;  %v3866_v47 = vmul.f32 %v3764_v2, %v3764_v2 }
 0x20c   : > { %3795 = vst [vmem:[%s6609_s29 + $0xf0] sm:$0xff] %v3763_v5  ;;  %v3826_v7 = vadd.f32 %v3825_v6, %v3763_v5  ;;  %v3865_v9 = vmul.f32 %v3763_v5, %v3763_v5  ;;  %v3895_v10 = vadd.f32 %v3894_v4, %v3864_v46 }
 0x20e   : > { %v3827_v55 = vadd.f32 %v3826_v7, %v3764_v2  ;;  %v3896_v57 = vadd.f32 %v3895_v10, %v3865_v9 }
 0x210   : > { %v3828_v28 = vrot.slane %v3827_v55, 4  ;;  %v3897_v24 = vadd.f32 %v3896_v57, %v3866_v47 }
 0x212   : > { %v3829_v48 = vadd.f32 %v3828_v28, %v3827_v55  ;;  %v3898_v25 = vrot.slane %v3897_v24, 4 }
 0x214   : > { %v3830_v8 = vrot.slane %v3829_v48, 2  ;;  %v3899_v11 = vadd.f32 %v3898_v25, %v3897_v24 }
 0x216   : > { %v3831_v13 = vadd.f32 %v3830_v8, %v3829_v48  ;;  %v3900_v15 = vrot.slane %v3899_v11, 2 }
 0x218   : > { %v3832_v52 = vrot.slane %v3831_v13, 1  ;;  %v3901_v17 = vadd.f32 %v3900_v15, %v3899_v11 }
 0x21a   : > { %v3833_v19 = vadd.f32 %v3832_v52, %v3831_v13  ;;  %v3902_v49 = vrot.slane %v3901_v17, 1 }
 0x21c   : > { %3834 = vst [vmem:[%s263_s8] sm:$0x1] %v3833_v19  ;;  %v3903_v21 = vadd.f32 %v3902_v49, %v3901_v17 }
 0x21e   : > { %3904 = vst [vmem:[%s268_s11] sm:$0x1] %v3903_v21 }
 0x21f PF: > { %s16_s20 = sadd.s32 1, %s5599_s20   ;;  %s6814_s18 = smov %s5595_s19 }
 0x220   : > { %p13_p6 = scmp.ge.s32.totalorder %s16_s20, 4   ;;  %s6815_s19 = smov %s6817_s21 }
 0x222   :  { %15 = sbr.rel (!%p13_p6) target bundleno = 2 (0x2), region = 97 }

</bundles_post_ra>
